<compile_context>
chip_gen: v5e
topology: v5e:2x2
jax: 0.10.0
libtpu: 0.0.40
codegen_flags: <defaults>
</compile_context>

<pallas_src>
import jax
import jax.numpy as jnp
from jax.experimental import pallas as pl
from jax.experimental.pallas import tpu as pltpu

IN_DIM = 1162
HID_DIM = 512
OUT_DIM = 3

IN_PAD = 1280    # next multiple of 128 >= 1162
OUT_PAD = 128    # lane-dense logits / output tile
NEG_BIG = -1e30  # padded-logit bias: exp(NEG_BIG - m) underflows to 0


def _round_up(n: int, m: int) -> int:
    return ((n + m - 1) // m) * m


def _device_discriminator_kernel(x_ref, w1_ref, b1_ref, w2_ref, b2_ref, o_ref):
    x = x_ref[...]                                            # [TB, 1280] bf16

    # fc1: Linear(1280 -> 512) on the MXU (bf16 in, f32 accumulate).
    h = jnp.dot(x, w1_ref[...], preferred_element_type=jnp.float32) + b1_ref[...]

    # Softplus (beta=1), numerically stable: max(h,0) + log1p(exp(-|h|)).
    h = jnp.maximum(h, 0.0) + jnp.log1p(jnp.exp(-jnp.abs(h)))

    # fc2: Linear(512 -> 128-padded) on the MXU. Padded columns have zero
    # weights and a -1e30 bias, so they contribute nothing after softmax.
    logits = jnp.dot(h.astype(jnp.bfloat16), w2_ref[...],
                     preferred_element_type=jnp.float32) + b2_ref[...]

    # Softmax over the (padded) last axis == softmax over the real 3 logits.
    m = jnp.max(logits, axis=-1, keepdims=True)
    e = jnp.exp(logits - m)
    o_ref[...] = (e / jnp.sum(e, axis=-1, keepdims=True)).astype(o_ref.dtype)


def prepare_params(w1, b1, w2, b2):
    """Pad/cast PyTorch-layout f32 params once for the kernel.

    w1: [1162, 512], b1: [1,512] (or [512]), w2: [512, 3], b2: [1,3] (or [3]).
    Returns (w1p bf16 [1280,512], b1p f32 [1,512], w2p bf16 [512,128],
             b2p f32 [1,128]).
    """
    w1 = jnp.asarray(w1, jnp.float32)
    w2 = jnp.asarray(w2, jnp.float32)
    b1 = jnp.asarray(b1, jnp.float32).reshape(1, HID_DIM)
    b2 = jnp.asarray(b2, jnp.float32).reshape(1, OUT_DIM)

    w1p = jnp.zeros((IN_PAD, HID_DIM), jnp.bfloat16)
    w1p = w1p.at[:IN_DIM, :].set(w1.astype(jnp.bfloat16))

    w2p = jnp.zeros((HID_DIM, OUT_PAD), jnp.bfloat16)
    w2p = w2p.at[:, :OUT_DIM].set(w2.astype(jnp.bfloat16))

    b2p = jnp.full((1, OUT_PAD), NEG_BIG, jnp.float32)
    b2p = b2p.at[:, :OUT_DIM].set(b2)

    return w1p, b1, w2p, b2p


def device_discriminator(x, params, *, tile_b: int = 512):
    """x: [B, 1162] f32 -> [B, 3] f32 (rows sum to 1)."""
    w1p, b1p, w2p, b2p = params
    B = x.shape[0]

    # Batch tile: cap at tile_b, but shrink (to a multiple of 8) for tiny B.
    tb = min(tile_b, _round_up(B, 8))
    b_pad = _round_up(B, tb)
    grid = (b_pad // tb,)

    # Pad batch rows (zeros) and feature lanes (1162 -> 1280), cast to bf16.
    x_p = jnp.pad(x.astype(jnp.bfloat16),
                  ((0, b_pad - B), (0, IN_PAD - IN_DIM)))

    out_padded = pl.pallas_call(
        _device_discriminator_kernel,
        out_shape=jax.ShapeDtypeStruct((b_pad, OUT_PAD), jnp.float32),
        grid=grid,
        in_specs=[
            pl.BlockSpec((tb, IN_PAD), lambda i: (i, 0)),        # x tile (streamed)
            pl.BlockSpec((IN_PAD, HID_DIM), lambda i: (0, 0)),   # W1 (resident)
            pl.BlockSpec((1, HID_DIM), lambda i: (0, 0)),        # b1 (resident)
            pl.BlockSpec((HID_DIM, OUT_PAD), lambda i: (0, 0)),  # W2 (resident)
            pl.BlockSpec((1, OUT_PAD), lambda i: (0, 0)),        # b2 (resident)
        ],
        out_specs=pl.BlockSpec((tb, OUT_PAD), lambda i: (i, 0)),
        compiler_params=pltpu.CompilerParams(
            dimension_semantics=("parallel",),
            vmem_limit_bytes=32 * 1024 * 1024,
        ),
    )(x_p, w1p, b1p, w2p, b2p)

    # Drop batch padding and the padded logit lanes.
    return out_padded[:B, :OUT_DIM]


def init_params(key):
    """Deterministic parameter init (uniform, PyTorch-like fan_in scaling)."""
    k1, k2, k3, k4 = jax.random.split(key, 4)
    lim1 = 1.0 / jnp.sqrt(IN_DIM)
    lim2 = 1.0 / jnp.sqrt(HID_DIM)
    w1 = jax.random.uniform(k1, (IN_DIM, HID_DIM), jnp.float32, -lim1, lim1)
    b1 = jax.random.uniform(k2, (1, HID_DIM), jnp.float32, -lim1, lim1)
    w2 = jax.random.uniform(k3, (HID_DIM, OUT_DIM), jnp.float32, -lim2, lim2)
    b2 = jax.random.uniform(k4, (1, OUT_DIM), jnp.float32, -lim2, lim2)
    return w1, b1, w2, b2


def _reference(x, w1, b1, w2, b2):
    """Pure-JAX f32 reference of the PyTorch forward."""
    h = x @ w1 + b1
    h = jnp.maximum(h, 0.0) + jnp.log1p(jnp.exp(-jnp.abs(h)))   # softplus
    logits = h @ w2 + b2
    return jax.nn.softmax(logits, axis=-1)


if __name__ == "__main__":
    key = jax.random.PRNGKey(0)
    k_x, k_p = jax.random.split(key)

    B = 2
    x = jax.random.normal(k_x, (B, IN_DIM), jnp.float32)
    w1, b1, w2, b2 = init_params(k_p)
    params = prepare_params(w1, b1, w2, b2)

    out = device_discriminator(x, params)
    out = jax.block_until_ready(out)

    # sanity: shape, finiteness, softmax row-sum, and match vs f32 reference
    assert out.shape == (B, OUT_DIM)
    assert bool(jnp.all(jnp.isfinite(out)))
    assert jnp.allclose(jnp.sum(out, axis=-1), 1.0, atol=1e-4)
    ref = _reference(x, w1, b1, w2, b2)
    assert jnp.allclose(out, ref, atol=3e-2), (out, ref)  # bf16-matmul tolerance

    print("KERNEL_OK")
</pallas_src>

<mosaic_0001>
module attributes {stable_mosaic.version = 11 : i64} {
  func.func @_device_discriminator_kernel(%arg0: i32, %arg1: memref<8x1280xbf16, #tpu.memory_space<vmem>>, %arg2: memref<1280x512xbf16, #tpu.memory_space<vmem>>, %arg3: memref<1x512xf32, #tpu.memory_space<vmem>>, %arg4: memref<512x128xbf16, #tpu.memory_space<vmem>>, %arg5: memref<1x128xf32, #tpu.memory_space<vmem>>, %arg6: memref<8x128xf32, #tpu.memory_space<vmem>>) attributes {dimension_semantics = [#tpu.dimension_semantics<parallel>], iteration_bounds = array<i64: 1>, scalar_prefetch = 0 : i64, scratch_operands = 0 : i64, tpu.core_type = #tpu.core_type<tc>, window_params = [{transform_indices = @transform_0, window_bounds = array<i64: 8, 1280>}, {pipeline_mode = #tpu.pipeline_mode<synchronous>, transform_indices = @transform_1, window_bounds = array<i64: 1280, 512>}, {pipeline_mode = #tpu.pipeline_mode<synchronous>, transform_indices = @transform_2, window_bounds = array<i64: 1, 512>}, {pipeline_mode = #tpu.pipeline_mode<synchronous>, transform_indices = @transform_3, window_bounds = array<i64: 512, 128>}, {pipeline_mode = #tpu.pipeline_mode<synchronous>, transform_indices = @transform_4, window_bounds = array<i64: 1, 128>}, {transform_indices = @transform_5, window_bounds = array<i64: 8, 128>}]} {
    %c0 = arith.constant 0 : index
    %c0_0 = arith.constant 0 : index
    %0 = vector.load %arg1[%c0, %c0_0] : memref<8x1280xbf16, #tpu.memory_space<vmem>>, vector<8x1280xbf16>
    %c0_1 = arith.constant 0 : index
    %c0_2 = arith.constant 0 : index
    %1 = vector.load %arg2[%c0_1, %c0_2] : memref<1280x512xbf16, #tpu.memory_space<vmem>>, vector<1280x512xbf16>
    %cst = arith.constant dense<0.000000e+00> : vector<8x512xf32>
    %2 = tpu.matmul %0, %1, %cst {dimension_numbers = #tpu.dot_dimension_numbers<[1], [0], [0], [1], [0, 0, 1, 1], [], []>} : vector<8x1280xbf16>, vector<1280x512xbf16>, vector<8x512xf32> -> vector<8x512xf32>
    %c0_3 = arith.constant 0 : index
    %c0_4 = arith.constant 0 : index
    %3 = vector.load %arg3[%c0_3, %c0_4] : memref<1x512xf32, #tpu.memory_space<vmem>>, vector<1x512xf32>
    %4 = vector.broadcast %3 : vector<1x512xf32> to vector<8x512xf32>
    %5 = arith.addf %2, %4 : vector<8x512xf32>
    %cst_5 = arith.constant 0.000000e+00 : f32
    %6 = vector.broadcast %cst_5 : f32 to vector<8x512xf32>
    %7 = arith.maximumf %5, %6 : vector<8x512xf32>
    %8 = math.absf %5 : vector<8x512xf32>
    %cst_6 = arith.constant 0.000000e+00 : f32
    %9 = vector.broadcast %cst_6 : f32 to vector<8x512xf32>
    %10 = arith.subf %9, %8 : vector<8x512xf32>
    %11 = math.exp %10 : vector<8x512xf32>
    %12 = math.log1p %11 : vector<8x512xf32>
    %13 = arith.addf %7, %12 : vector<8x512xf32>
    %14 = arith.truncf %13 : vector<8x512xf32> to vector<8x512xbf16>
    %c0_7 = arith.constant 0 : index
    %c0_8 = arith.constant 0 : index
    %15 = vector.load %arg4[%c0_7, %c0_8] : memref<512x128xbf16, #tpu.memory_space<vmem>>, vector<512x128xbf16>
    %cst_9 = arith.constant dense<0.000000e+00> : vector<8x128xf32>
    %16 = tpu.matmul %14, %15, %cst_9 {dimension_numbers = #tpu.dot_dimension_numbers<[1], [0], [0], [1], [0, 0, 1, 1], [], []>} : vector<8x512xbf16>, vector<512x128xbf16>, vector<8x128xf32> -> vector<8x128xf32>
    %c0_10 = arith.constant 0 : index
    %c0_11 = arith.constant 0 : index
    %17 = vector.load %arg5[%c0_10, %c0_11] : memref<1x128xf32, #tpu.memory_space<vmem>>, vector<1x128xf32>
    %18 = vector.broadcast %17 : vector<1x128xf32> to vector<8x128xf32>
    %19 = arith.addf %16, %18 : vector<8x128xf32>
    %cst_12 = arith.constant dense<0xFF800000> : vector<8xf32>
    %20 = vector.multi_reduction <maximumf>, %19, %cst_12 [1] : vector<8x128xf32> to vector<8xf32>
    %21 = vector.shape_cast %20 : vector<8xf32> to vector<8x1xf32>
    %22 = vector.broadcast %21 : vector<8x1xf32> to vector<8x128xf32>
    %23 = arith.subf %19, %22 : vector<8x128xf32>
    %24 = math.exp %23 : vector<8x128xf32>
    %cst_13 = arith.constant dense<0.000000e+00> : vector<8xf32>
    %25 = vector.multi_reduction <add>, %24, %cst_13 [1] : vector<8x128xf32> to vector<8xf32>
    %26 = vector.shape_cast %25 : vector<8xf32> to vector<8x1xf32>
    %27 = vector.broadcast %26 : vector<8x1xf32> to vector<8x128xf32>
    %28 = arith.divf %24, %27 : vector<8x128xf32>
    %c0_14 = arith.constant 0 : index
    %c0_15 = arith.constant 0 : index
    %29 = vector.load %arg6[%c0_14, %c0_15] : memref<8x128xf32, #tpu.memory_space<vmem>>, vector<8x128xf32>
    tpu.vector_store %arg6[%c0_14, %c0_15], %28 {strides = array<i32>} : memref<8x128xf32, #tpu.memory_space<vmem>>, vector<8x128xf32>,
    return
  }
  func.func @transform_0(%arg0: i32) -> (i32, i32) {
    %c0_i32 = arith.constant 0 : i32
    %c0_i32_0 = arith.constant 0 : i32
    return %arg0, %c0_i32 : i32, i32
  }
  func.func @transform_1(%arg0: i32) -> (i32, i32) {
    %c0_i32 = arith.constant 0 : i32
    %c0_i32_0 = arith.constant 0 : i32
    %c0_i32_1 = arith.constant 0 : i32
    return %c0_i32, %c0_i32_0 : i32, i32
  }
  func.func @transform_2(%arg0: i32) -> (i32, i32) {
    %c0_i32 = arith.constant 0 : i32
    %c0_i32_0 = arith.constant 0 : i32
    %c0_i32_1 = arith.constant 0 : i32
    return %c0_i32, %c0_i32_0 : i32, i32
  }
  func.func @transform_3(%arg0: i32) -> (i32, i32) {
    %c0_i32 = arith.constant 0 : i32
    %c0_i32_0 = arith.constant 0 : i32
    %c0_i32_1 = arith.constant 0 : i32
    return %c0_i32, %c0_i32_0 : i32, i32
  }
  func.func @transform_4(%arg0: i32) -> (i32, i32) {
    %c0_i32 = arith.constant 0 : i32
    %c0_i32_0 = arith.constant 0 : i32
    %c0_i32_1 = arith.constant 0 : i32
    return %c0_i32, %c0_i32_0 : i32, i32
  }
  func.func @transform_5(%arg0: i32) -> (i32, i32) {
    %c0_i32 = arith.constant 0 : i32
    %c0_i32_0 = arith.constant 0 : i32
    return %arg0, %c0_i32 : i32, i32
  }
}

</mosaic_0001>

<bundles_post_ra>
// kernel: tpu_custom_call.1
= control target key start
LH: loop header
LB: loop body
LE: loop exit
PB: predicated region body
PF: predicated region fallthrough
CT: control target
= control target key end

     0   :  { %10 = vsyncpa [#allocation3], 0  ;;  %s5103_s0 = inlined_call_operand.hbm [shape: bf16[8,1280], index: 0, kind: input, shape index: {}]   ;;  %s5104_s1 = inlined_call_operand.hbm [shape: bf16[1280,512], index: 1, kind: input, shape index: {}]   ;;  %s5105_s2 = inlined_call_operand.hbm [shape: f32[1,512], index: 2, kind: input, shape index: {}]   ;;  %s5106_s3 = inlined_call_operand.hbm [shape: bf16[512,128], index: 3, kind: input, shape index: {}]   ;;  %s5107_s4 = inlined_call_operand.hbm [shape: f32[1,128], index: 4, kind: input, shape index: {}]   ;;  %s5108_s5 = inlined_call_operand.hbm [shape: f32[8,128], index: 5, kind: output, shape index: {}]  }
   0x1   :  { %11 = vsyncpa [#allocation6], 0 }
   0x2   :  { %12 = vsyncpa [#allocation9], 0  ;;  %s29_s20 = sshll.u32 %s5104_s1, 4  ;;  %s30_s20 = int_to_ptr.hbm [resolvable:$true] %s29_s20 }
   0x3   :  { %13 = vsyncpa [#allocation4], 0  ;;  %s4945_s21 = smov [#allocation5]   ;;  %s53_s25 = sshll.u32 %s5106_s3, 4  ;;  %s54_s25 = int_to_ptr.hbm [resolvable:$true] %s53_s25 }
   0x4   :  { %s31_s22 = sshll.u32 %s4945_s21, 4  ;;  %s4946_s26 = smov 256   ;;  %s32_s22 = int_to_ptr.vmem [resolvable:$true] %s31_s22 }
   0x5   :  { %s4947_s27 = smov 16   ;;  %s4948_s28 = smov [#allocation8]  }
   0x6   :  { %37 = dma.hbm_to_vmem [thread:$0]  %s30_s20, 40960, %s32_s22, [#allocation6], %s4946_s26, %s4946_s26, %s4947_s27  }
   0x7   :  { %s55_s29 = sshll.u32 %s4948_s28, 4  ;;  %s4949_s30 = smov 64   ;;  %s56_s29 = int_to_ptr.vmem [resolvable:$true] %s55_s29 }
   0x8   :  { %s4950_s6 = smov 4   ;;  %s19_s8 = sshll.u32 %s5103_s0, 4  ;;  %s20_s8 = int_to_ptr.hbm [resolvable:$true] %s19_s8 }
   0x9   :  { %61 = dma.hbm_to_vmem [thread:$0]  %s54_s25, 4096, %s56_s29, [#allocation9], %s4949_s30, %s4949_s30, %s4950_s6  }
   0xa   :  { %s4951_s9 = smov [#allocation2]   ;;  %s43_s12 = sshll.u32 %s5105_s2, 4  ;;  %s44_s12 = int_to_ptr.hbm [resolvable:$true] %s43_s12 }
   0xb   :  { %s21_s10 = sshll.u32 %s4951_s9, 4  ;;  %s4952_s13 = smov [#allocation7]   ;;  %s22_s10 = int_to_ptr.vmem [resolvable:$true] %s21_s10 }
   0xc   :  { %24 = dma.hbm_to_vmem [thread:$0]  %s20_s8, 640, %s22_s10, [#allocation3]  }
   0xd   :  { %s45_s14 = sshll.u32 %s4952_s13, 4  ;;  %s67_s17 = sshll.u32 %s5107_s4, 4  ;;  %s46_s14 = int_to_ptr.vmem [resolvable:$true] %s45_s14  ;;  %s68_s17 = int_to_ptr.hbm [resolvable:$true] %s67_s17 }
   0xe   :  { %48 = dma.hbm_to_vmem [thread:$0]  %s44_s12, 64, %s46_s14, [#allocation6]  }
   0xf   :  { %s4953_s0 = smov [#allocation10]  }
  0x10   :  { %s69_s18 = sshll.u32 %s4953_s0, 4  ;;  %s70_s18 = int_to_ptr.vmem [resolvable:$true] %s69_s18 }
  0x11   :  { %72 = dma.hbm_to_vmem [thread:$0]  %s68_s17, 16, %s70_s18, [#allocation9]  }
  0x12   :  { %4937 = dma.done.wait [#allocation3], 640  }
  0x13   :  { %4938 = vsyncadd [#allocation3], 4294966656 }
  0x14   :  { %4939 = dma.done.wait [#allocation6], 41024  }
  0x15   :  { %4940 = vsyncadd [#allocation6], 4294926272 }
  0x16   :  { %4941 = dma.done.wait [#allocation9], 4112  }
  0x17   :  { %4942 = vsyncadd [#allocation9], 4294963184  ;;  %v3115_v0 = vld [vmem:[#allocation5 + $0xe0] sm:$0xf]  ;;  %v4439_v1 = vld [vmem:[#allocation5 + $0xec] sm:$0xf0] }
  0x18   :  { %v3243_v2 = vld [vmem:[#allocation5 + $0x1e0] sm:$0xf]  ;;  %v3116_v3 = vor.u32 %v4439_v1, %v3115_v0  ;;  %v4471_v4 = vld [vmem:[#allocation5 + $0x1ec] sm:$0xf0]  ;;  %s4954_s2 = smov [#allocation11]   ;;  %s2989_s21 = sshll.u32 %s5108_s5, 4  ;;  %s2990_s21 = int_to_ptr.hbm [resolvable:$true] %s2989_s21 }
  0x19   :  { %v3371_v5 = vld [vmem:[#allocation5 + $0x2e0] sm:$0xf]  ;;  %v4503_v6 = vld [vmem:[#allocation5 + $0x2ec] sm:$0xf0]  ;;  %v3244_v7 = vor.u32 %v4471_v4, %v3243_v2  ;;  %s2987_s4 = sshll.u32 %s4954_s2, 4  ;;  %s2988_s4 = int_to_ptr.vmem [resolvable:$true] %s2987_s4 }
  0x1a   :  { %v3372_v8 = vor.u32 %v4503_v6, %v3371_v5  ;;  %v3499_v9 = vld [vmem:[#allocation5 + $0x3e0] sm:$0xf]  ;;  %v4535_v10 = vld [vmem:[#allocation5 + $0x3ec] sm:$0xf0]  ;;  %2063 = vmatpush.bf16.msra.mxu0 %v3116_v3 }
  0x1b   :  { %v3099_v11 = vld [vmem:[#allocation5 + $0xc0] sm:$0xf]  ;;  %v3500_v12 = vor.u32 %v4535_v10, %v3499_v9  ;;  %v4435_v13 = vld [vmem:[#allocation5 + $0xcc] sm:$0xf0]  ;;  %2076 = vmatpush.bf16.msra.mxu1 %v3244_v7 }
  0x1c   :  { %v3227_v14 = vld [vmem:[#allocation5 + $0x1c0] sm:$0xf]  ;;  %v4467_v15 = vld [vmem:[#allocation5 + $0x1cc] sm:$0xf0]  ;;  %2089 = vmatpush.bf16.msra.mxu2 %v3372_v8  ;;  %v3100_v16 = vor.u32 %v4435_v13, %v3099_v11 }
  0x1d   :  { %v3228_v17 = vor.u32 %v4467_v15, %v3227_v14  ;;  %v3355_v18 = vld [vmem:[#allocation5 + $0x2c0] sm:$0xf]  ;;  %v4499_v19 = vld [vmem:[#allocation5 + $0x2cc] sm:$0xf0]  ;;  %2102 = vmatpush.bf16.msra.mxu3 %v3500_v12 }
  0x1e   :  { %v3483_v20 = vld [vmem:[#allocation5 + $0x3c0] sm:$0xf]  ;;  %v3356_v21 = vor.u32 %v4499_v19, %v3355_v18  ;;  %v4531_v22 = vld [vmem:[#allocation5 + $0x3cc] sm:$0xf0]  ;;  %2064 = vmatpush.bf16.msra.mxu0 %v3100_v16 }
  0x1f   :  { %v3083_v23 = vld [vmem:[#allocation5 + $0xa0] sm:$0xf]  ;;  %v4431_v24 = vld [vmem:[#allocation5 + $0xac] sm:$0xf0]  ;;  %v3484_v25 = vor.u32 %v4531_v22, %v3483_v20  ;;  %2077 = vmatpush.bf16.msra.mxu1 %v3228_v17 }
  0x20   :  { %v3211_v26 = vld [vmem:[#allocation5 + $0x1a0] sm:$0xf]  ;;  %v4463_v27 = vld [vmem:[#allocation5 + $0x1ac] sm:$0xf0]  ;;  %v3084_v29 = vor.u32 %v4431_v24, %v3083_v23  ;;  %2090 = vmatpush.bf16.msra.mxu2 %v3356_v21 }
  0x21   :  { %v3339_v28 = vld [vmem:[#allocation5 + $0x2a0] sm:$0xf]  ;;  %v4495_v30 = vld [vmem:[#allocation5 + $0x2ac] sm:$0xf0]  ;;  %v3212_v33 = vor.u32 %v4463_v27, %v3211_v26  ;;  %2103 = vmatpush.bf16.msra.mxu3 %v3484_v25 }
  0x22   :  { %v3467_v31 = vld [vmem:[#allocation5 + $0x3a0] sm:$0xf]  ;;  %v4527_v32 = vld [vmem:[#allocation5 + $0x3ac] sm:$0xf0]  ;;  %v3340_v34 = vor.u32 %v4495_v30, %v3339_v28  ;;  %2065 = vmatpush.bf16.msra.mxu0 %v3084_v29 }
  0x23   :  { %v3067_v35 = vld [vmem:[#allocation5 + $0x80] sm:$0xf]  ;;  %v4427_v36 = vld [vmem:[#allocation5 + $0x8c] sm:$0xf0]  ;;  %v3468_v38 = vor.u32 %v4527_v32, %v3467_v31  ;;  %2078 = vmatpush.bf16.msra.mxu1 %v3212_v33 }
  0x24   :  { %v3195_v37 = vld [vmem:[#allocation5 + $0x180] sm:$0xf]  ;;  %v4459_v39 = vld [vmem:[#allocation5 + $0x18c] sm:$0xf0]  ;;  %v3068_v44 = vor.u32 %v4427_v36, %v3067_v35  ;;  %2091 = vmatpush.bf16.msra.mxu2 %v3340_v34 }
  0x25   :  { %v3323_v40 = vld [vmem:[#allocation5 + $0x280] sm:$0xf]  ;;  %v4491_v41 = vld [vmem:[#allocation5 + $0x28c] sm:$0xf0]  ;;  %v3196_v45 = vor.u32 %v4459_v39, %v3195_v37  ;;  %2104 = vmatpush.bf16.msra.mxu3 %v3468_v38 }
  0x26   :  { %v3451_v42 = vld [vmem:[#allocation5 + $0x380] sm:$0xf]  ;;  %v4523_v43 = vld [vmem:[#allocation5 + $0x38c] sm:$0xf0]  ;;  %v3324_v46 = vor.u32 %v4491_v41, %v3323_v40  ;;  %2066 = vmatpush.bf16.msra.mxu0 %v3068_v44 }
  0x27   :  { %v3051_v47 = vld [vmem:[#allocation5 + $0x60] sm:$0xf]  ;;  %v4423_v48 = vld [vmem:[#allocation5 + $0x6c] sm:$0xf0]  ;;  %v3452_v50 = vor.u32 %v4523_v43, %v3451_v42  ;;  %2079 = vmatpush.bf16.msra.mxu1 %v3196_v45 }
  0x28   :  { %v3179_v49 = vld [vmem:[#allocation5 + $0x160] sm:$0xf]  ;;  %v4455_v51 = vld [vmem:[#allocation5 + $0x16c] sm:$0xf0]  ;;  %v3052_v56 = vor.u32 %v4423_v48, %v3051_v47  ;;  %2092 = vmatpush.bf16.msra.mxu2 %v3324_v46 }
  0x29   :  { %v3307_v52 = vld [vmem:[#allocation5 + $0x260] sm:$0xf]  ;;  %v4487_v53 = vld [vmem:[#allocation5 + $0x26c] sm:$0xf0]  ;;  %v3180_v57 = vor.u32 %v4455_v51, %v3179_v49  ;;  %2105 = vmatpush.bf16.msra.mxu3 %v3452_v50 }
  0x2a   :  { %v3435_v54 = vld [vmem:[#allocation5 + $0x360] sm:$0xf]  ;;  %v4519_v55 = vld [vmem:[#allocation5 + $0x36c] sm:$0xf0]  ;;  %v3308_v58 = vor.u32 %v4487_v53, %v3307_v52  ;;  %2067 = vmatpush.bf16.msra.mxu0 %v3052_v56 }
  0x2b   :  { %v3035_v59 = vld [vmem:[#allocation5 + $0x40] sm:$0xf]  ;;  %v4419_v60 = vld [vmem:[#allocation5 + $0x4c] sm:$0xf0]  ;;  %v3436_v62 = vor.u32 %v4519_v55, %v3435_v54  ;;  %2080 = vmatpush.bf16.msra.mxu1 %v3180_v57 }
  0x2c   :  { %v3163_v61 = vld [vmem:[#allocation5 + $0x140] sm:$0xf]  ;;  %v4451_v63 = vld [vmem:[#allocation5 + $0x14c] sm:$0xf0]  ;;  %v3036_v4 = vor.u32 %v4419_v60, %v3035_v59  ;;  %2093 = vmatpush.bf16.msra.mxu2 %v3308_v58 }
  0x2d   :  { %v3291_v0 = vld [vmem:[#allocation5 + $0x240] sm:$0xf]  ;;  %v4483_v1 = vld [vmem:[#allocation5 + $0x24c] sm:$0xf0]  ;;  %v3164_v5 = vor.u32 %v4451_v63, %v3163_v61  ;;  %2106 = vmatpush.bf16.msra.mxu3 %v3436_v62 }
  0x2e   :  { %v3419_v2 = vld [vmem:[#allocation5 + $0x340] sm:$0xf]  ;;  %v4515_v3 = vld [vmem:[#allocation5 + $0x34c] sm:$0xf0]  ;;  %v3292_v6 = vor.u32 %v4483_v1, %v3291_v0  ;;  %2068 = vmatpush.bf16.msra.mxu0 %v3036_v4 }
  0x2f   :  { %v3019_v7 = vld [vmem:[#allocation5 + $0x20] sm:$0xf]  ;;  %v4415_v8 = vld [vmem:[#allocation5 + $0x2c] sm:$0xf0]  ;;  %v3420_v10 = vor.u32 %v4515_v3, %v3419_v2  ;;  %2081 = vmatpush.bf16.msra.mxu1 %v3164_v5  ;;  %v93_v3 = vld [vmem:[#allocation2] sm:$0xff] }
  0x30   :  { %v3147_v9 = vld [vmem:[#allocation5 + $0x120] sm:$0xf]  ;;  %v4447_v11 = vld [vmem:[#allocation5 + $0x12c] sm:$0xf0]  ;;  %v3020_v16 = vor.u32 %v4415_v8, %v3019_v7  ;;  %2094 = vmatpush.bf16.msra.mxu2 %v3292_v6 }
  0x31   :  { %v3275_v12 = vld [vmem:[#allocation5 + $0x220] sm:$0xf]  ;;  %v4479_v13 = vld [vmem:[#allocation5 + $0x22c] sm:$0xf0]  ;;  %v3148_v19 = vor.u32 %v4447_v11, %v3147_v9  ;;  %2107 = vmatpush.bf16.msra.mxu3 %v3420_v10  ;;  %v433_v9 = vunpack.c.l.b16 %v93_v3 }
  0x32   :  { %v3403_v14 = vld [vmem:[#allocation5 + $0x320] sm:$0xf]  ;;  %v4511_v15 = vld [vmem:[#allocation5 + $0x32c] sm:$0xf0]  ;;  %v3276_v20 = vor.u32 %v4479_v13, %v3275_v12  ;;  %2069 = vmatpush.bf16.msra.mxu0 %v3020_v16 }
  0x33   :  { %v3003_v17 = vld [vmem:[#allocation5] sm:$0xf]  ;;  %v4411_v18 = vld [vmem:[#allocation5 + $0xc] sm:$0xf0]  ;;  %v3404_v24 = vor.u32 %v4511_v15, %v3403_v14  ;;  %2082 = vmatpush.bf16.msra.mxu1 %v3148_v19  ;;  %v434_v15 = vunpack.c.h.b16 %v93_v3  ;;  %v5002_v19 = vpack.c.b16 %v433_v9, %v433_v9 }
  0x34   :  { %v3131_v21 = vld [vmem:[#allocation5 + $0x100] sm:$0xf]  ;;  %v4443_v22 = vld [vmem:[#allocation5 + $0x10c] sm:$0xf0]  ;;  %v3004_v31 = vor.u32 %v4411_v18, %v3003_v17  ;;  %2095 = vmatpush.bf16.msra.mxu2 %v3276_v20 }
  0x35   :  { %v3259_v23 = vld [vmem:[#allocation5 + $0x200] sm:$0xf]  ;;  %v4475_v25 = vld [vmem:[#allocation5 + $0x20c] sm:$0xf0]  ;;  %v3132_v35 = vor.u32 %v4443_v22, %v3131_v21  ;;  %2108 = vmatpush.bf16.msra.mxu3 %v3404_v24  ;;  %v5006_v22 = vpack.c.b16 %v434_v15, %v434_v15 }
  0x36   :  { %v3387_v26 = vld [vmem:[#allocation5 + $0x300] sm:$0xf]  ;;  %v4507_v27 = vld [vmem:[#allocation5 + $0x30c] sm:$0xf0]  ;;  %v3260_v36 = vor.u32 %v4475_v25, %v3259_v23  ;;  %2070 = vmatpush.bf16.msra.mxu0 %v3004_v31 }
  0x37   :  { %v3627_v28 = vld [vmem:[#allocation5 + $0x4e0] sm:$0xf]  ;;  %v4567_v29 = vld [vmem:[#allocation5 + $0x4ec] sm:$0xf0]  ;;  %v3388_v39 = vor.u32 %v4507_v27, %v3387_v26  ;;  %2083 = vmatpush.bf16.msra.mxu1 %v3132_v35 }
  0x38   :  { %v3755_v30 = vld [vmem:[#allocation5 + $0x5e0] sm:$0xf]  ;;  %v4599_v32 = vld [vmem:[#allocation5 + $0x5ec] sm:$0xf0]  ;;  %v3628_v40 = vor.u32 %v4567_v29, %v3627_v28  ;;  %2096 = vmatpush.bf16.msra.mxu2 %v3260_v36 }
  0x39   :  { %v3883_v33 = vld [vmem:[#allocation5 + $0x6e0] sm:$0xf]  ;;  %v4631_v34 = vld [vmem:[#allocation5 + $0x6ec] sm:$0xf0]  ;;  %v3756_v41 = vor.u32 %v4599_v32, %v3755_v30  ;;  %2109 = vmatpush.bf16.msra.mxu3 %v3388_v39  ;;  %2071 = vmatmul.bf16.vlgmr.msra.gmra.mxu0 %v5002_v19 }
  0x3a   :  { %v4011_v37 = vld [vmem:[#allocation5 + $0x7e0] sm:$0xf]  ;;  %v4663_v38 = vld [vmem:[#allocation5 + $0x7ec] sm:$0xf0]  ;;  %v3884_v42 = vor.u32 %v4631_v34, %v3883_v33  ;;  %2115 = vmatpush.bf16.msrb.mxu0 %v3628_v40  ;;  %2084 = vmatmul.bf16.vlgmr.msra.gmra.mxu1 %v5006_v22 }
  0x3b   :  { %v3611_v43 = vld [vmem:[#allocation5 + $0x4c0] sm:$0xf]  ;;  %v4563_v44 = vld [vmem:[#allocation5 + $0x4cc] sm:$0xf0]  ;;  %v4012_v46 = vor.u32 %v4663_v38, %v4011_v37  ;;  %2128 = vmatpush.bf16.msrb.mxu1 %v3756_v41 }
  0x3c   :  { %v3739_v45 = vld [vmem:[#allocation5 + $0x5c0] sm:$0xf]  ;;  %v4595_v47 = vld [vmem:[#allocation5 + $0x5cc] sm:$0xf0]  ;;  %v3612_v52 = vor.u32 %v4563_v44, %v3611_v43  ;;  %2141 = vmatpush.bf16.msrb.mxu2 %v3884_v42 }
  0x3d   :  { %v3867_v48 = vld [vmem:[#allocation5 + $0x6c0] sm:$0xf]  ;;  %v4627_v49 = vld [vmem:[#allocation5 + $0x6cc] sm:$0xf0]  ;;  %v3740_v54 = vor.u32 %v4595_v47, %v3739_v45  ;;  %2154 = vmatpush.bf16.msrb.mxu3 %v4012_v46 }
  0x3e   :  { %v3995_v50 = vld [vmem:[#allocation5 + $0x7c0] sm:$0xf]  ;;  %v4659_v51 = vld [vmem:[#allocation5 + $0x7cc] sm:$0xf0]  ;;  %v3868_v55 = vor.u32 %v4627_v49, %v3867_v48  ;;  %2116 = vmatpush.bf16.msrb.mxu0 %v3612_v52 }
  0x3f   :  { %v3595_v53 = vld [vmem:[#allocation5 + $0x4a0] sm:$0xf]  ;;  %v4559_v56 = vld [vmem:[#allocation5 + $0x4ac] sm:$0xf0]  ;;  %v3996_v59 = vor.u32 %v4659_v51, %v3995_v50  ;;  %2129 = vmatpush.bf16.msrb.mxu1 %v3740_v54 }
  0x40   :  { %v3723_v57 = vld [vmem:[#allocation5 + $0x5a0] sm:$0xf]  ;;  %v4591_v58 = vld [vmem:[#allocation5 + $0x5ac] sm:$0xf0]  ;;  %v3596_v0 = vor.u32 %v4559_v56, %v3595_v53  ;;  %2142 = vmatpush.bf16.msrb.mxu2 %v3868_v55 }
  0x41   :  { %v3851_v60 = vld [vmem:[#allocation5 + $0x6a0] sm:$0xf]  ;;  %v4623_v61 = vld [vmem:[#allocation5 + $0x6ac] sm:$0xf0]  ;;  %v3724_v1 = vor.u32 %v4591_v58, %v3723_v57  ;;  %2155 = vmatpush.bf16.msrb.mxu3 %v3996_v59 }
  0x42   :  { %v3979_v62 = vld [vmem:[#allocation5 + $0x7a0] sm:$0xf]  ;;  %v4655_v63 = vld [vmem:[#allocation5 + $0x7ac] sm:$0xf0]  ;;  %v3852_v4 = vor.u32 %v4623_v61, %v3851_v60  ;;  %2117 = vmatpush.bf16.msrb.mxu0 %v3596_v0 }
  0x43   :  { %v94_v2 = vld [vmem:[#allocation2 + $0x8] sm:$0xff]  ;;  %v4555_v6 = vld [vmem:[#allocation5 + $0x48c] sm:$0xf0]  ;;  %v3980_v11 = vor.u32 %v4655_v63, %v3979_v62  ;;  %2130 = vmatpush.bf16.msrb.mxu1 %v3724_v1 }
  0x44   :  { %v3579_v5 = vld [vmem:[#allocation5 + $0x480] sm:$0xf]  ;;  %v435_v8 = vunpack.c.l.b16 %v94_v2  ;;  %v436_v10 = vunpack.c.h.b16 %v94_v2  ;;  %v4587_v12 = vld [vmem:[#allocation5 + $0x58c] sm:$0xf0]  ;;  %2143 = vmatpush.bf16.msrb.mxu2 %v3852_v4 }
  0x45   :  { %v3707_v7 = vld [vmem:[#allocation5 + $0x580] sm:$0xf]  ;;  %v4619_v14 = vld [vmem:[#allocation5 + $0x68c] sm:$0xf0]  ;;  %v3580_v21 = vor.u32 %v4555_v6, %v3579_v5  ;;  %2156 = vmatpush.bf16.msrb.mxu3 %v3980_v11 }
  0x46   :  { %v3835_v13 = vld [vmem:[#allocation5 + $0x680] sm:$0xf]  ;;  %v4651_v17 = vld [vmem:[#allocation5 + $0x78c] sm:$0xf0]  ;;  %v5000_v18 = vpack.c.b16 %v435_v8, %v435_v8  ;;  %v5004_v20 = vpack.c.b16 %v436_v10, %v436_v10  ;;  %v3708_v23 = vor.u32 %v4587_v12, %v3707_v7  ;;  %v95_v7 = vld [vmem:[#allocation2 + $0x10] sm:$0xff] }
  0x47   :  { %v3963_v16 = vld [vmem:[#allocation5 + $0x780] sm:$0xf]  ;;  %v3836_v24 = vor.u32 %v4619_v14, %v3835_v13  ;;  %v4551_v26 = vld [vmem:[#allocation5 + $0x46c] sm:$0xf0]  ;;  %2118 = vmatpush.bf16.msrb.mxu0 %v3580_v21  ;;  %v4437_v13 = vld [vmem:[#allocation5 + $0xe4] sm:$0xf] }
  0x48   :  { %v3563_v25 = vld [vmem:[#allocation5 + $0x460] sm:$0xf]  ;;  %v3964_v28 = vor.u32 %v4651_v17, %v3963_v16  ;;  %v4583_v29 = vld [vmem:[#allocation5 + $0x56c] sm:$0xf0]  ;;  %2097 = vmatmul.bf16.vlgmr.msra.gmra.mxu2 %v5000_v18  ;;  %2110 = vmatmul.bf16.vlgmr.msra.gmra.mxu3 %v5004_v20  ;;  %v3117_v14 = vld [vmem:[#allocation5 + $0xf0] sm:$0xf0] }
  0x49   :  { %v3691_v27 = vld [vmem:[#allocation5 + $0x560] sm:$0xf]  ;;  %v4615_v31 = vld [vmem:[#allocation5 + $0x66c] sm:$0xf0]  ;;  %v3564_v34 = vor.u32 %v4551_v26, %v3563_v25  ;;  %2131 = vmatpush.bf16.msrb.mxu1 %v3708_v23  ;;  %2144 = vmatpush.bf16.msrb.mxu2 %v3836_v24  ;;  %v4469_v21 = vld [vmem:[#allocation5 + $0x1e4] sm:$0xf]  ;;  %v437_v24 = vunpack.c.l.b16 %v95_v7 }
  0x4a   :  { %v3819_v30 = vld [vmem:[#allocation5 + $0x660] sm:$0xf]  ;;  %v4647_v33 = vld [vmem:[#allocation5 + $0x76c] sm:$0xf0]  ;;  %v3692_v35 = vor.u32 %v4583_v29, %v3691_v27  ;;  %2157 = vmatpush.bf16.msrb.mxu3 %v3964_v28  ;;  %v3245_v23 = vld [vmem:[#allocation5 + $0x1f0] sm:$0xf0]  ;;  %v438_v28 = vunpack.c.h.b16 %v95_v7 }
  0x4b   :  { %v3947_v32 = vld [vmem:[#allocation5 + $0x760] sm:$0xf]  ;;  %v3820_v36 = vor.u32 %v4615_v31, %v3819_v30  ;;  %v4547_v38 = vld [vmem:[#allocation5 + $0x44c] sm:$0xf0]  ;;  %2119 = vmatpush.bf16.msrb.mxu0 %v3564_v34  ;;  %v3120_v30 = vor.u32 %v4437_v13, %v3117_v14  ;;  %v3248_v34 = vor.u32 %v4469_v21, %v3245_v23  ;;  %v3053_v13 = vld [vmem:[#allocation5 + $0x70] sm:$0xf0] }
  0x4c   :  { %v3547_v37 = vld [vmem:[#allocation5 + $0x440] sm:$0xf]  ;;  %v3948_v40 = vor.u32 %v4647_v33, %v3947_v32  ;;  %v4579_v41 = vld [vmem:[#allocation5 + $0x54c] sm:$0xf0]  ;;  %v4453_v14 = vld [vmem:[#allocation5 + $0x164] sm:$0xf] }
  0x4d   :  { %v3675_v39 = vld [vmem:[#allocation5 + $0x540] sm:$0xf]  ;;  %v4611_v43 = vld [vmem:[#allocation5 + $0x64c] sm:$0xf0]  ;;  %v3548_v46 = vor.u32 %v4547_v38, %v3547_v37  ;;  %2132 = vmatpush.bf16.msrb.mxu1 %v3692_v35  ;;  %2145 = vmatpush.bf16.msrb.mxu2 %v3820_v36  ;;  %v4433_v36 = vld [vmem:[#allocation5 + $0xc4] sm:$0xf] }
  0x4e   :  { %v3803_v42 = vld [vmem:[#allocation5 + $0x640] sm:$0xf]  ;;  %v4643_v45 = vld [vmem:[#allocation5 + $0x74c] sm:$0xf0]  ;;  %v3676_v47 = vor.u32 %v4579_v41, %v3675_v39  ;;  %2158 = vmatpush.bf16.msrb.mxu3 %v3948_v40  ;;  %v3101_v37 = vld [vmem:[#allocation5 + $0xd0] sm:$0xf0]  ;;  %v5014_v41 = vpack.c.b16 %v437_v24, %v437_v24 }
  0x4f   :  { %v3931_v44 = vld [vmem:[#allocation5 + $0x740] sm:$0xf]  ;;  %v3804_v48 = vor.u32 %v4611_v43, %v3803_v42  ;;  %v4543_v50 = vld [vmem:[#allocation5 + $0x42c] sm:$0xf0]  ;;  %2120 = vmatpush.bf16.msrb.mxu0 %v3548_v46  ;;  %v4465_v39 = vld [vmem:[#allocation5 + $0x1c4] sm:$0xf]  ;;  %v3104_v46 = vor.u32 %v4433_v36, %v3101_v37 }
  0x50   :  { %v3531_v49 = vld [vmem:[#allocation5 + $0x420] sm:$0xf]  ;;  %v3932_v52 = vor.u32 %v4643_v45, %v3931_v44  ;;  %v4575_v53 = vld [vmem:[#allocation5 + $0x52c] sm:$0xf0]  ;;  %v3229_v40 = vld [vmem:[#allocation5 + $0x1d0] sm:$0xf0]  ;;  %v5018_v44 = vpack.c.b16 %v438_v28, %v438_v28 }
  0x51   :  { %v3659_v51 = vld [vmem:[#allocation5 + $0x520] sm:$0xf]  ;;  %v4607_v55 = vld [vmem:[#allocation5 + $0x62c] sm:$0xf0]  ;;  %v3532_v59 = vor.u32 %v4543_v50, %v3531_v49  ;;  %2133 = vmatpush.bf16.msrb.mxu1 %v3676_v47  ;;  %2146 = vmatpush.bf16.msrb.mxu2 %v3804_v48  ;;  %v3232_v50 = vor.u32 %v4465_v39, %v3229_v40  ;;  %v4417_v28 = vld [vmem:[#allocation5 + $0x44] sm:$0xf] }
  0x52   :  { %v3787_v54 = vld [vmem:[#allocation5 + $0x620] sm:$0xf]  ;;  %v4639_v57 = vld [vmem:[#allocation5 + $0x72c] sm:$0xf0]  ;;  %v3660_v63 = vor.u32 %v4575_v53, %v3659_v51  ;;  %2159 = vmatpush.bf16.msrb.mxu3 %v3932_v52  ;;  %v4429_v52 = vld [vmem:[#allocation5 + $0xa4] sm:$0xf] }
  0x53   :  { %v3915_v56 = vld [vmem:[#allocation5 + $0x720] sm:$0xf]  ;;  %v4539_v60 = vld [vmem:[#allocation5 + $0x40c] sm:$0xf0]  ;;  %v3788_v0 = vor.u32 %v4607_v55, %v3787_v54  ;;  %2121 = vmatpush.bf16.msrb.mxu0 %v3532_v59  ;;  %v3085_v53 = vld [vmem:[#allocation5 + $0xb0] sm:$0xf0] }
  0x54   :  { %v3515_v58 = vld [vmem:[#allocation5 + $0x400] sm:$0xf]  ;;  %v4571_v62 = vld [vmem:[#allocation5 + $0x50c] sm:$0xf0]  ;;  %v3916_v4 = vor.u32 %v4639_v57, %v3915_v56  ;;  %v4461_v54 = vld [vmem:[#allocation5 + $0x1a4] sm:$0xf] }
  0x55   :  { %v3643_v61 = vld [vmem:[#allocation5 + $0x500] sm:$0xf]  ;;  %v4603_v2 = vld [vmem:[#allocation5 + $0x60c] sm:$0xf0]  ;;  %v3516_v11 = vor.u32 %v4539_v60, %v3515_v58  ;;  %2134 = vmatpush.bf16.msrb.mxu1 %v3660_v63  ;;  %2147 = vmatpush.bf16.msrb.mxu2 %v3788_v0  ;;  %v3213_v55 = vld [vmem:[#allocation5 + $0x1b0] sm:$0xf0]  ;;  %v3088_v58 = vor.u32 %v4429_v52, %v3085_v53 }
  0x56   :  { %v3771_v1 = vld [vmem:[#allocation5 + $0x600] sm:$0xf]  ;;  %v96_v3 = vld [vmem:[#allocation2 + $0x18] sm:$0xff]  ;;  %v3644_v16 = vor.u32 %v4571_v62, %v3643_v61  ;;  %2160 = vmatpush.bf16.msrb.mxu3 %v3916_v4  ;;  %v3216_v62 = vor.u32 %v4461_v54, %v3213_v55  ;;  %v4425_v0 = vld [vmem:[#allocation5 + $0x84] sm:$0xf] }
  0x57   :  { %v3899_v5 = vld [vmem:[#allocation5 + $0x700] sm:$0xf]  ;;  %v4635_v6 = vld [vmem:[#allocation5 + $0x70c] sm:$0xf0]  ;;  %v439_v15 = vunpack.c.l.b16 %v96_v3  ;;  %v3772_v17 = vor.u32 %v4603_v2, %v3771_v1  ;;  %v440_v25 = vunpack.c.h.b16 %v96_v3  ;;  %2122 = vmatpush.bf16.msrb.mxu0 %v3516_v11  ;;  %v3069_v1 = vld [vmem:[#allocation5 + $0x90] sm:$0xf0] }
  0x58   :  { %v4139_v8 = vld [vmem:[#allocation5 + $0x8e0] sm:$0xf]  ;;  %v4695_v9 = vld [vmem:[#allocation5 + $0x8ec] sm:$0xf0]  ;;  %v3900_v26 = vor.u32 %v4635_v6, %v3899_v5  ;;  %v4457_v2 = vld [vmem:[#allocation5 + $0x184] sm:$0xf]  ;;  %v3072_v6 = vor.u32 %v4425_v0, %v3069_v1 }
  0x59   :  { %v4267_v10 = vld [vmem:[#allocation5 + $0x9e0] sm:$0xf]  ;;  %v4727_v12 = vld [vmem:[#allocation5 + $0x9ec] sm:$0xf0]  ;;  %v4140_v27 = vor.u32 %v4695_v9, %v4139_v8  ;;  %v5012_v38 = vpack.c.b16 %v439_v15, %v439_v15  ;;  %2135 = vmatpush.bf16.msrb.mxu1 %v3644_v16  ;;  %2148 = vmatpush.bf16.msrb.mxu2 %v3772_v17  ;;  %v5016_v42 = vpack.c.b16 %v440_v25, %v440_v25  ;;  %v3197_v3 = vld [vmem:[#allocation5 + $0x190] sm:$0xf0] }
  0x5a   :  { %v4268_v29 = vor.u32 %v4727_v12, %v4267_v10  ;;  %v4123_v31 = vld [vmem:[#allocation5 + $0x8c0] sm:$0xf]  ;;  %v4691_v32 = vld [vmem:[#allocation5 + $0x8cc] sm:$0xf0]  ;;  %2161 = vmatpush.bf16.msrb.mxu3 %v3900_v26  ;;  %2123 = vmatmul.bf16.vlgmr.msrb.gmra.mxu0 %v5014_v41  ;;  %v3200_v10 = vor.u32 %v4457_v2, %v3197_v3  ;;  %v4421_v12 = vld [vmem:[#allocation5 + $0x64] sm:$0xf] }
  0x5b   :  { %v4251_v33 = vld [vmem:[#allocation5 + $0x9c0] sm:$0xf]  ;;  %v4723_v35 = vld [vmem:[#allocation5 + $0x9cc] sm:$0xf0]  ;;  %2167 = vmatpush.bf16.msra.mxu0 %v4140_v27  ;;  %v4124_v43 = vor.u32 %v4691_v32, %v4123_v31  ;;  %v3181_v15 = vld [vmem:[#allocation5 + $0x170] sm:$0xf0]  ;;  %v3056_v21 = vor.u32 %v4421_v12, %v3053_v13 }
  0x5c   :  { %v4252_v45 = vor.u32 %v4723_v35, %v4251_v33  ;;  %v4107_v47 = vld [vmem:[#allocation5 + $0x8a0] sm:$0xf]  ;;  %v4687_v48 = vld [vmem:[#allocation5 + $0x8ac] sm:$0xf0]  ;;  %2149 = vmatmul.bf16.vlgmr.msrb.gmra.mxu2 %v5012_v38  ;;  %2136 = vmatmul.bf16.vlgmr.msrb.gmra.mxu1 %v5018_v44  ;;  %v3184_v26 = vor.u32 %v4453_v14, %v3181_v15  ;;  %v3165_v31 = vld [vmem:[#allocation5 + $0x150] sm:$0xf0] }
  0x5d   :  { %2180 = vmatpush.bf16.msra.mxu1 %v4268_v29  ;;  %2193 = vmatpush.bf16.msra.mxu2 %v3120_v30  ;;  %v4235_v49 = vld [vmem:[#allocation5 + $0x9a0] sm:$0xf]  ;;  %v4719_v51 = vld [vmem:[#allocation5 + $0x9ac] sm:$0xf0]  ;;  %v4108_v56 = vor.u32 %v4687_v48, %v4107_v47  ;;  %v3037_v29 = vld [vmem:[#allocation5 + $0x50] sm:$0xf0] }
  0x5e   :  { %2206 = vmatpush.bf16.msra.mxu3 %v3248_v34  ;;  %v4236_v57 = vor.u32 %v4719_v51, %v4235_v49  ;;  %v4091_v59 = vld [vmem:[#allocation5 + $0x880] sm:$0xf]  ;;  %v4683_v60 = vld [vmem:[#allocation5 + $0x88c] sm:$0xf0]  ;;  %v4449_v30 = vld [vmem:[#allocation5 + $0x144] sm:$0xf]  ;;  %v3040_v34 = vor.u32 %v4417_v28, %v3037_v29 }
  0x5f   :  { %2162 = vmatmul.bf16.vlgmr.msrb.gmra.mxu3 %v5016_v42  ;;  %2168 = vmatpush.bf16.msra.mxu0 %v4124_v43  ;;  %v4219_v61 = vld [vmem:[#allocation5 + $0x980] sm:$0xf]  ;;  %v4715_v63 = vld [vmem:[#allocation5 + $0x98c] sm:$0xf0]  ;;  %v4092_v4 = vor.u32 %v4683_v60, %v4091_v59  ;;  %v3168_v39 = vor.u32 %v4449_v30, %v3165_v31  ;;  %v4413_v43 = vld [vmem:[#allocation5 + $0x24] sm:$0xf] }
  0x60   :  { %v4220_v5 = vor.u32 %v4715_v63, %v4219_v61  ;;  %v4075_v7 = vld [vmem:[#allocation5 + $0x860] sm:$0xf]  ;;  %v4679_v8 = vld [vmem:[#allocation5 + $0x86c] sm:$0xf0]  ;;  %v3149_v47 = vld [vmem:[#allocation5 + $0x130] sm:$0xf0] }
  0x61   :  { %2181 = vmatpush.bf16.msra.mxu1 %v4252_v45  ;;  %2194 = vmatpush.bf16.msra.mxu2 %v3104_v46  ;;  %v4203_v9 = vld [vmem:[#allocation5 + $0x960] sm:$0xf]  ;;  %v4711_v11 = vld [vmem:[#allocation5 + $0x96c] sm:$0xf0]  ;;  %v4076_v16 = vor.u32 %v4679_v8, %v4075_v7  ;;  %v3021_v45 = vld [vmem:[#allocation5 + $0x30] sm:$0xf0] }
  0x62   :  { %2207 = vmatpush.bf16.msra.mxu3 %v3232_v50  ;;  %v4204_v17 = vor.u32 %v4711_v11, %v4203_v9  ;;  %v4059_v23 = vld [vmem:[#allocation5 + $0x840] sm:$0xf]  ;;  %v4675_v24 = vld [vmem:[#allocation5 + $0x84c] sm:$0xf0]  ;;  %v4445_v46 = vld [vmem:[#allocation5 + $0x124] sm:$0xf]  ;;  %v3024_v53 = vor.u32 %v4413_v43, %v3021_v45 }
  0x63   :  { %2169 = vmatpush.bf16.msra.mxu0 %v4108_v56  ;;  %v4187_v25 = vld [vmem:[#allocation5 + $0x940] sm:$0xf]  ;;  %v4707_v27 = vld [vmem:[#allocation5 + $0x94c] sm:$0xf0]  ;;  %v4060_v32 = vor.u32 %v4675_v24, %v4059_v23  ;;  %v4409_v55 = vld [vmem:[#allocation5 + $0x4] sm:$0xf] }
  0x64   :  { %v4188_v33 = vor.u32 %v4707_v27, %v4187_v25  ;;  %v4043_v35 = vld [vmem:[#allocation5 + $0x820] sm:$0xf]  ;;  %v4671_v36 = vld [vmem:[#allocation5 + $0x82c] sm:$0xf0]  ;;  %v97_v56 = vld [vmem:[#allocation2 + $0x20] sm:$0xff] }
  0x65   :  { %2182 = vmatpush.bf16.msra.mxu1 %v4236_v57  ;;  %2195 = vmatpush.bf16.msra.mxu2 %v3088_v58  ;;  %v4171_v37 = vld [vmem:[#allocation5 + $0x920] sm:$0xf]  ;;  %v4703_v40 = vld [vmem:[#allocation5 + $0x92c] sm:$0xf0]  ;;  %v4044_v48 = vor.u32 %v4671_v36, %v4043_v35  ;;  %v3152_v57 = vor.u32 %v4445_v46, %v3149_v47  ;;  %v3005_v58 = vld [vmem:[#allocation5 + $0x10] sm:$0xf0]  ;;  %v442_v9 = vunpack.c.h.b16 %v97_v56 }
  0x66   :  { %2208 = vmatpush.bf16.msra.mxu3 %v3216_v62  ;;  %v4027_v49 = vld [vmem:[#allocation5 + $0x800] sm:$0xf]  ;;  %v4667_v50 = vld [vmem:[#allocation5 + $0x80c] sm:$0xf0]  ;;  %v4172_v52 = vor.u32 %v4703_v40, %v4171_v37  ;;  %v4441_v59 = vld [vmem:[#allocation5 + $0x104] sm:$0xf] }
  0x67   :  { %2170 = vmatpush.bf16.msra.mxu0 %v4092_v4  ;;  %v4155_v51 = vld [vmem:[#allocation5 + $0x900] sm:$0xf]  ;;  %v4699_v54 = vld [vmem:[#allocation5 + $0x90c] sm:$0xf0]  ;;  %v3133_v60 = vld [vmem:[#allocation5 + $0x110] sm:$0xf0]  ;;  %v4028_v0 = vor.u32 %v4667_v50, %v4027_v49  ;;  %v441_v4 = vunpack.c.l.b16 %v97_v56 }
  0x68   :  { %v4501_v61 = vld [vmem:[#allocation5 + $0x2e4] sm:$0xf]  ;;  %v3373_v62 = vld [vmem:[#allocation5 + $0x2f0] sm:$0xf0] }
  0x69   :  { %2183 = vmatpush.bf16.msra.mxu1 %v4220_v5  ;;  %2196 = vmatpush.bf16.msra.mxu2 %v3072_v6  ;;  %v4533_v63 = vld [vmem:[#allocation5 + $0x3e4] sm:$0xf]  ;;  %v3501_v1 = vld [vmem:[#allocation5 + $0x3f0] sm:$0xf0]  ;;  %v4156_v5 = vor.u32 %v4699_v54, %v4155_v51  ;;  %v3008_v6 = vor.u32 %v4409_v55, %v3005_v58  ;;  %v3376_v11 = vor.u32 %v4501_v61, %v3373_v62 }
  0x6a   :  { %2209 = vmatpush.bf16.msra.mxu3 %v3200_v10  ;;  %v4565_v2 = vld [vmem:[#allocation5 + $0x4e4] sm:$0xf]  ;;  %v3629_v3 = vld [vmem:[#allocation5 + $0x4f0] sm:$0xf0]  ;;  %v3136_v10 = vor.u32 %v4441_v59, %v3133_v60  ;;  %v3504_v12 = vor.u32 %v4533_v63, %v3501_v1 }
  0x6b   :  { %2171 = vmatpush.bf16.msra.mxu0 %v4076_v16  ;;  %v4597_v7 = vld [vmem:[#allocation5 + $0x5e4] sm:$0xf]  ;;  %v3757_v8 = vld [vmem:[#allocation5 + $0x5f0] sm:$0xf0]  ;;  %v3632_v13 = vor.u32 %v4565_v2, %v3629_v3 }
  0x6c   :  { %v4497_v14 = vld [vmem:[#allocation5 + $0x2c4] sm:$0xf]  ;;  %v3357_v15 = vld [vmem:[#allocation5 + $0x2d0] sm:$0xf0] }
  0x6d   :  { %2184 = vmatpush.bf16.msra.mxu1 %v4204_v17  ;;  %2197 = vmatpush.bf16.msra.mxu2 %v3056_v21  ;;  %v4529_v16 = vld [vmem:[#allocation5 + $0x3c4] sm:$0xf]  ;;  %v3760_v17 = vor.u32 %v4597_v7, %v3757_v8  ;;  %v5024_v21 = vpack.c.b16 %v441_v4, %v441_v4  ;;  %v3485_v23 = vld [vmem:[#allocation5 + $0x3d0] sm:$0xf0]  ;;  %v3360_v29 = vor.u32 %v4497_v14, %v3357_v15 }
  0x6e   :  { %2210 = vmatpush.bf16.msra.mxu3 %v3184_v26  ;;  %v4561_v24 = vld [vmem:[#allocation5 + $0x4c4] sm:$0xf]  ;;  %v3613_v25 = vld [vmem:[#allocation5 + $0x4d0] sm:$0xf0]  ;;  %v5026_v26 = vpack.c.b16 %v442_v9, %v442_v9  ;;  %v3488_v30 = vor.u32 %v4529_v16, %v3485_v23 }
  0x6f   :  { %2172 = vmatpush.bf16.msra.mxu0 %v4060_v32  ;;  %v4593_v27 = vld [vmem:[#allocation5 + $0x5c4] sm:$0xf]  ;;  %v3741_v28 = vld [vmem:[#allocation5 + $0x5d0] sm:$0xf0]  ;;  %v3616_v31 = vor.u32 %v4561_v24, %v3613_v25 }
  0x70   :  { %v4493_v32 = vld [vmem:[#allocation5 + $0x2a4] sm:$0xf]  ;;  %v3744_v35 = vor.u32 %v4593_v27, %v3741_v28  ;;  %v3469_v36 = vld [vmem:[#allocation5 + $0x3b0] sm:$0xf0] }
  0x71   :  { %2185 = vmatpush.bf16.msra.mxu1 %v4188_v33  ;;  %2198 = vmatpush.bf16.msra.mxu2 %v3040_v34  ;;  %v3341_v33 = vld [vmem:[#allocation5 + $0x2b0] sm:$0xf0]  ;;  %v4525_v34 = vld [vmem:[#allocation5 + $0x3a4] sm:$0xf] }
  0x72   :  { %2211 = vmatpush.bf16.msra.mxu3 %v3168_v39  ;;  %v4557_v37 = vld [vmem:[#allocation5 + $0x4a4] sm:$0xf]  ;;  %v3597_v39 = vld [vmem:[#allocation5 + $0x4b0] sm:$0xf0]  ;;  %v3344_v45 = vor.u32 %v4493_v32, %v3341_v33  ;;  %v3472_v46 = vor.u32 %v4525_v34, %v3469_v36 }
  0x73   :  { %2173 = vmatpush.bf16.msra.mxu0 %v4044_v48  ;;  %v4589_v40 = vld [vmem:[#allocation5 + $0x5a4] sm:$0xf]  ;;  %v3725_v43 = vld [vmem:[#allocation5 + $0x5b0] sm:$0xf0]  ;;  %v3600_v47 = vor.u32 %v4557_v37, %v3597_v39 }
  0x74   :  { %v4489_v48 = vld [vmem:[#allocation5 + $0x284] sm:$0xf]  ;;  %v3325_v49 = vld [vmem:[#allocation5 + $0x290] sm:$0xf0]  ;;  %v3728_v51 = vor.u32 %v4589_v40, %v3725_v43 }
  0x75   :  { %2186 = vmatpush.bf16.msra.mxu1 %v4172_v52  ;;  %2199 = vmatpush.bf16.msra.mxu2 %v3024_v53  ;;  %v4521_v50 = vld [vmem:[#allocation5 + $0x384] sm:$0xf]  ;;  %v3453_v52 = vld [vmem:[#allocation5 + $0x390] sm:$0xf0] }
  0x76   :  { %2212 = vmatpush.bf16.msra.mxu3 %v3152_v57  ;;  %v4553_v53 = vld [vmem:[#allocation5 + $0x484] sm:$0xf]  ;;  %v3581_v54 = vld [vmem:[#allocation5 + $0x490] sm:$0xf0]  ;;  %v3328_v57 = vor.u32 %v4489_v48, %v3325_v49  ;;  %v3456_v58 = vor.u32 %v4521_v50, %v3453_v52 }
  0x77   :  { %2174 = vmatpush.bf16.msra.mxu0 %v4028_v0  ;;  %v4585_v55 = vld [vmem:[#allocation5 + $0x584] sm:$0xf]  ;;  %v3709_v56 = vld [vmem:[#allocation5 + $0x590] sm:$0xf0]  ;;  %v3584_v59 = vor.u32 %v4553_v53, %v3581_v54 }
  0x78   :  { %v4485_v60 = vld [vmem:[#allocation5 + $0x264] sm:$0xf]  ;;  %v3309_v61 = vld [vmem:[#allocation5 + $0x270] sm:$0xf0]  ;;  %v3712_v63 = vor.u32 %v4585_v55, %v3709_v56 }
  0x79   :  { %2187 = vmatpush.bf16.msra.mxu1 %v4156_v5  ;;  %2200 = vmatpush.bf16.msra.mxu2 %v3008_v6  ;;  %v4517_v62 = vld [vmem:[#allocation5 + $0x364] sm:$0xf]  ;;  %v3437_v0 = vld [vmem:[#allocation5 + $0x370] sm:$0xf0]  ;;  %v3312_v5 = vor.u32 %v4485_v60, %v3309_v61 }
  0x7a   :  { %2213 = vmatpush.bf16.msra.mxu3 %v3136_v10  ;;  %2175 = vmatmul.bf16.vlgmr.msra.gmra.mxu0 %v5024_v21  ;;  %v4549_v1 = vld [vmem:[#allocation5 + $0x464] sm:$0xf]  ;;  %v3565_v2 = vld [vmem:[#allocation5 + $0x470] sm:$0xf0]  ;;  %v3440_v6 = vor.u32 %v4517_v62, %v3437_v0 }
  0x7b   :  { %2219 = vmatpush.bf16.msrb.mxu0 %v3376_v11  ;;  %v4581_v3 = vld [vmem:[#allocation5 + $0x564] sm:$0xf]  ;;  %v3693_v4 = vld [vmem:[#allocation5 + $0x570] sm:$0xf0]  ;;  %v3568_v7 = vor.u32 %v4549_v1, %v3565_v2 }
  0x7c   :  { %2188 = vmatmul.bf16.vlgmr.msra.gmra.mxu1 %v5026_v26  ;;  %2201 = vmatmul.bf16.vlgmr.msra.gmra.mxu2 %v5002_v19  ;;  %v4481_v8 = vld [vmem:[#allocation5 + $0x244] sm:$0xf]  ;;  %v3293_v9 = vld [vmem:[#allocation5 + $0x250] sm:$0xf0]  ;;  %v3696_v11 = vor.u32 %v4581_v3, %v3693_v4 }
  0x7d   :  { %2232 = vmatpush.bf16.msrb.mxu1 %v3504_v12  ;;  %2245 = vmatpush.bf16.msrb.mxu2 %v3632_v13  ;;  %v4513_v10 = vld [vmem:[#allocation5 + $0x344] sm:$0xf]  ;;  %v3421_v12 = vld [vmem:[#allocation5 + $0x350] sm:$0xf0] }
  0x7e   :  { %2258 = vmatpush.bf16.msrb.mxu3 %v3760_v17  ;;  %v4545_v13 = vld [vmem:[#allocation5 + $0x444] sm:$0xf]  ;;  %v3549_v14 = vld [vmem:[#allocation5 + $0x450] sm:$0xf0]  ;;  %v3296_v17 = vor.u32 %v4481_v8, %v3293_v9  ;;  %v3424_v23 = vor.u32 %v4513_v10, %v3421_v12 }
  0x7f   :  { %2220 = vmatpush.bf16.msrb.mxu0 %v3360_v29  ;;  %2214 = vmatmul.bf16.vlgmr.msra.gmra.mxu3 %v5006_v22  ;;  %v4577_v15 = vld [vmem:[#allocation5 + $0x544] sm:$0xf]  ;;  %v3677_v16 = vld [vmem:[#allocation5 + $0x550] sm:$0xf0]  ;;  %v3552_v24 = vor.u32 %v4545_v13, %v3549_v14 }
  0x80   :  { %v4477_v25 = vld [vmem:[#allocation5 + $0x224] sm:$0xf]  ;;  %v3277_v27 = vld [vmem:[#allocation5 + $0x230] sm:$0xf0]  ;;  %v3680_v29 = vor.u32 %v4577_v15, %v3677_v16 }
  0x81   :  { %2233 = vmatpush.bf16.msrb.mxu1 %v3488_v30  ;;  %2246 = vmatpush.bf16.msrb.mxu2 %v3616_v31  ;;  %v4509_v28 = vld [vmem:[#allocation5 + $0x324] sm:$0xf]  ;;  %v3405_v30 = vld [vmem:[#allocation5 + $0x330] sm:$0xf0] }
  0x82   :  { %2259 = vmatpush.bf16.msrb.mxu3 %v3744_v35  ;;  %v4541_v31 = vld [vmem:[#allocation5 + $0x424] sm:$0xf]  ;;  %v3533_v32 = vld [vmem:[#allocation5 + $0x430] sm:$0xf0]  ;;  %v3280_v35 = vor.u32 %v4477_v25, %v3277_v27  ;;  %v3408_v39 = vor.u32 %v4509_v28, %v3405_v30 }
  0x83   :  { %2221 = vmatpush.bf16.msrb.mxu0 %v3344_v45  ;;  %v4573_v33 = vld [vmem:[#allocation5 + $0x524] sm:$0xf]  ;;  %v3661_v34 = vld [vmem:[#allocation5 + $0x530] sm:$0xf0]  ;;  %v3536_v40 = vor.u32 %v4541_v31, %v3533_v32 }
  0x84   :  { %v4473_v36 = vld [vmem:[#allocation5 + $0x204] sm:$0xf]  ;;  %v3261_v37 = vld [vmem:[#allocation5 + $0x210] sm:$0xf0] }
  0x85   :  { %2234 = vmatpush.bf16.msrb.mxu1 %v3472_v46  ;;  %2247 = vmatpush.bf16.msrb.mxu2 %v3600_v47  ;;  %v4505_v43 = vld [vmem:[#allocation5 + $0x304] sm:$0xf]  ;;  %v3389_v45 = vld [vmem:[#allocation5 + $0x310] sm:$0xf0]  ;;  %v3664_v47 = vor.u32 %v4573_v33, %v3661_v34  ;;  %v3264_v54 = vor.u32 %v4473_v36, %v3261_v37 }
  0x86   :  { %2260 = vmatpush.bf16.msrb.mxu3 %v3728_v51  ;;  %v4537_v46 = vld [vmem:[#allocation5 + $0x404] sm:$0xf]  ;;  %v3517_v48 = vld [vmem:[#allocation5 + $0x410] sm:$0xf0] }
  0x87   :  { %2222 = vmatpush.bf16.msrb.mxu0 %v3328_v57  ;;  %v4569_v49 = vld [vmem:[#allocation5 + $0x504] sm:$0xf]  ;;  %v3645_v50 = vld [vmem:[#allocation5 + $0x510] sm:$0xf0] }
  0x88   :  { %v4629_v51 = vld [vmem:[#allocation5 + $0x6e4] sm:$0xf]  ;;  %v3885_v52 = vld [vmem:[#allocation5 + $0x6f0] sm:$0xf0]  ;;  %v3648_v62 = vor.u32 %v4569_v49, %v3645_v50 }
  0x89   :  { %2235 = vmatpush.bf16.msrb.mxu1 %v3456_v58  ;;  %2248 = vmatpush.bf16.msrb.mxu2 %v3584_v59  ;;  %v4661_v53 = vld [vmem:[#allocation5 + $0x7e4] sm:$0xf]  ;;  %v4013_v55 = vld [vmem:[#allocation5 + $0x7f0] sm:$0xf0]  ;;  %v3392_v58 = vor.u32 %v4505_v43, %v3389_v45  ;;  %v3520_v59 = vor.u32 %v4537_v46, %v3517_v48 }
  0x8a   :  { %2261 = vmatpush.bf16.msrb.mxu3 %v3712_v63  ;;  %v4693_v56 = vld [vmem:[#allocation5 + $0x8e4] sm:$0xf]  ;;  %v4141_v57 = vld [vmem:[#allocation5 + $0x8f0] sm:$0xf0]  ;;  %v3888_v63 = vor.u32 %v4629_v51, %v3885_v52  ;;  %v4016_v0 = vor.u32 %v4661_v53, %v4013_v55 }
  0x8b   :  { %2223 = vmatpush.bf16.msrb.mxu0 %v3312_v5  ;;  %v4725_v60 = vld [vmem:[#allocation5 + $0x9e4] sm:$0xf]  ;;  %v4269_v61 = vld [vmem:[#allocation5 + $0x9f0] sm:$0xf0]  ;;  %v4144_v1 = vor.u32 %v4693_v56, %v4141_v57 }
  0x8c   :  { %v4625_v2 = vld [vmem:[#allocation5 + $0x6c4] sm:$0xf]  ;;  %v3869_v3 = vld [vmem:[#allocation5 + $0x6d0] sm:$0xf0]  ;;  %v4272_v5 = vor.u32 %v4725_v60, %v4269_v61 }
  0x8d   :  { %2236 = vmatpush.bf16.msrb.mxu1 %v3440_v6  ;;  %2249 = vmatpush.bf16.msrb.mxu2 %v3568_v7  ;;  %v4657_v4 = vld [vmem:[#allocation5 + $0x7c4] sm:$0xf]  ;;  %v3997_v6 = vld [vmem:[#allocation5 + $0x7d0] sm:$0xf0] }
  0x8e   :  { %2262 = vmatpush.bf16.msrb.mxu3 %v3696_v11  ;;  %v4689_v7 = vld [vmem:[#allocation5 + $0x8c4] sm:$0xf]  ;;  %v4125_v8 = vld [vmem:[#allocation5 + $0x8d0] sm:$0xf0]  ;;  %v3872_v11 = vor.u32 %v4625_v2, %v3869_v3  ;;  %v4000_v12 = vor.u32 %v4657_v4, %v3997_v6 }
  0x8f   :  { %2224 = vmatpush.bf16.msrb.mxu0 %v3296_v17  ;;  %v4721_v9 = vld [vmem:[#allocation5 + $0x9c4] sm:$0xf]  ;;  %v4253_v10 = vld [vmem:[#allocation5 + $0x9d0] sm:$0xf0]  ;;  %v4128_v13 = vor.u32 %v4689_v7, %v4125_v8 }
  0x90   :  { %v4621_v14 = vld [vmem:[#allocation5 + $0x6a4] sm:$0xf]  ;;  %v3853_v15 = vld [vmem:[#allocation5 + $0x6b0] sm:$0xf0]  ;;  %v4256_v17 = vor.u32 %v4721_v9, %v4253_v10 }
  0x91   :  { %2237 = vmatpush.bf16.msrb.mxu1 %v3424_v23  ;;  %2250 = vmatpush.bf16.msrb.mxu2 %v3552_v24  ;;  %v4653_v16 = vld [vmem:[#allocation5 + $0x7a4] sm:$0xf]  ;;  %v3981_v23 = vld [vmem:[#allocation5 + $0x7b0] sm:$0xf0] }
  0x92   :  { %2263 = vmatpush.bf16.msrb.mxu3 %v3680_v29  ;;  %v4685_v24 = vld [vmem:[#allocation5 + $0x8a4] sm:$0xf]  ;;  %v4109_v25 = vld [vmem:[#allocation5 + $0x8b0] sm:$0xf0]  ;;  %v3856_v29 = vor.u32 %v4621_v14, %v3853_v15  ;;  %v3984_v30 = vor.u32 %v4653_v16, %v3981_v23 }
  0x93   :  { %2225 = vmatpush.bf16.msrb.mxu0 %v3280_v35  ;;  %v4717_v27 = vld [vmem:[#allocation5 + $0x9a4] sm:$0xf]  ;;  %v4237_v28 = vld [vmem:[#allocation5 + $0x9b0] sm:$0xf0]  ;;  %v4112_v31 = vor.u32 %v4685_v24, %v4109_v25 }
  0x94   :  { %v4617_v32 = vld [vmem:[#allocation5 + $0x684] sm:$0xf]  ;;  %v3837_v33 = vld [vmem:[#allocation5 + $0x690] sm:$0xf0]  ;;  %v4240_v35 = vor.u32 %v4717_v27, %v4237_v28 }
  0x95   :  { %2238 = vmatpush.bf16.msrb.mxu1 %v3408_v39  ;;  %2251 = vmatpush.bf16.msrb.mxu2 %v3536_v40  ;;  %v4649_v34 = vld [vmem:[#allocation5 + $0x784] sm:$0xf]  ;;  %v3965_v36 = vld [vmem:[#allocation5 + $0x790] sm:$0xf0]  ;;  %v3840_v45 = vor.u32 %v4617_v32, %v3837_v33 }
  0x96   :  { %2264 = vmatpush.bf16.msrb.mxu3 %v3664_v47  ;;  %v4681_v37 = vld [vmem:[#allocation5 + $0x884] sm:$0xf]  ;;  %v4093_v39 = vld [vmem:[#allocation5 + $0x890] sm:$0xf0]  ;;  %v3968_v46 = vor.u32 %v4649_v34, %v3965_v36  ;;  %v4440_v36 = vld [vmem:[#allocation5 + $0xf4] sm:$0xf0] }
  0x97   :  { %2226 = vmatpush.bf16.msrb.mxu0 %v3264_v54  ;;  %v4713_v40 = vld [vmem:[#allocation5 + $0x984] sm:$0xf]  ;;  %v4221_v43 = vld [vmem:[#allocation5 + $0x990] sm:$0xf0]  ;;  %v4096_v47 = vor.u32 %v4681_v37, %v4093_v39  ;;  %v3251_v37 = vld [vmem:[#allocation5 + $0x1e8] sm:$0xf] }
  0x98   :  { %v4613_v48 = vld [vmem:[#allocation5 + $0x664] sm:$0xf]  ;;  %v3821_v49 = vld [vmem:[#allocation5 + $0x670] sm:$0xf0]  ;;  %v4224_v51 = vor.u32 %v4713_v40, %v4221_v43  ;;  %v4472_v40 = vld [vmem:[#allocation5 + $0x1f4] sm:$0xf0] }
  0x99   :  { %2239 = vmatpush.bf16.msrb.mxu1 %v3392_v58  ;;  %2252 = vmatpush.bf16.msrb.mxu2 %v3520_v59  ;;  %v4645_v50 = vld [vmem:[#allocation5 + $0x764] sm:$0xf]  ;;  %v3949_v52 = vld [vmem:[#allocation5 + $0x770] sm:$0xf0]  ;;  %v3824_v57 = vor.u32 %v4613_v48, %v3821_v49  ;;  %v3379_v43 = vld [vmem:[#allocation5 + $0x2e8] sm:$0xf] }
  0x9a   :  { %2265 = vmatpush.bf16.msrb.mxu3 %v3648_v62  ;;  %2227 = vmatmul.bf16.vlgmr.msrb.gmra.mxu0 %v5000_v18  ;;  %v4677_v53 = vld [vmem:[#allocation5 + $0x864] sm:$0xf]  ;;  %v4077_v54 = vld [vmem:[#allocation5 + $0x870] sm:$0xf0]  ;;  %v3952_v58 = vor.u32 %v4645_v50, %v3949_v52  ;;  %v3507_v48 = vld [vmem:[#allocation5 + $0x3e8] sm:$0xf]  ;;  %v3252_v52 = vor.u32 %v4472_v40, %v3251_v37 }
  0x9b   :  { %2271 = vmatpush.bf16.msra.mxu0 %v3888_v63  ;;  %v4709_v55 = vld [vmem:[#allocation5 + $0x964] sm:$0xf]  ;;  %v4205_v56 = vld [vmem:[#allocation5 + $0x970] sm:$0xf0]  ;;  %v4080_v59 = vor.u32 %v4677_v53, %v4077_v54  ;;  %v4536_v49 = vld [vmem:[#allocation5 + $0x3f4] sm:$0xf0] }
  0x9c   :  { %2253 = vmatmul.bf16.vlgmr.msrb.gmra.mxu2 %v5014_v41  ;;  %2240 = vmatmul.bf16.vlgmr.msrb.gmra.mxu1 %v5004_v20  ;;  %v4609_v60 = vld [vmem:[#allocation5 + $0x644] sm:$0xf]  ;;  %v3805_v61 = vld [vmem:[#allocation5 + $0x650] sm:$0xf0]  ;;  %v4208_v63 = vor.u32 %v4709_v55, %v4205_v56  ;;  %v3107_v54 = vld [vmem:[#allocation5 + $0xc8] sm:$0xf] }
  0x9d   :  { %2284 = vmatpush.bf16.msra.mxu1 %v4016_v0  ;;  %2297 = vmatpush.bf16.msra.mxu2 %v4144_v1  ;;  %v4641_v62 = vld [vmem:[#allocation5 + $0x744] sm:$0xf]  ;;  %v3933_v0 = vld [vmem:[#allocation5 + $0x750] sm:$0xf0]  ;;  %v4436_v55 = vld [vmem:[#allocation5 + $0xd4] sm:$0xf0] }
  0x9e   :  { %2310 = vmatpush.bf16.msra.mxu3 %v4272_v5  ;;  %v4673_v1 = vld [vmem:[#allocation5 + $0x844] sm:$0xf]  ;;  %v4061_v2 = vld [vmem:[#allocation5 + $0x850] sm:$0xf0]  ;;  %v3808_v5 = vor.u32 %v4609_v60, %v3805_v61  ;;  %v3936_v6 = vor.u32 %v4641_v62, %v3933_v0  ;;  %v3235_v56 = vld [vmem:[#allocation5 + $0x1c8] sm:$0xf] }
  0x9f   :  { %2266 = vmatmul.bf16.vlgmr.msrb.gmra.mxu3 %v5018_v44  ;;  %2272 = vmatpush.bf16.msra.mxu0 %v3872_v11  ;;  %v4705_v3 = vld [vmem:[#allocation5 + $0x944] sm:$0xf]  ;;  %v4189_v4 = vld [vmem:[#allocation5 + $0x950] sm:$0xf0]  ;;  %v4064_v7 = vor.u32 %v4673_v1, %v4061_v2  ;;  %v4500_v60 = vld [vmem:[#allocation5 + $0x2d4] sm:$0xf0] }
  0xa0   :  { %v4605_v8 = vld [vmem:[#allocation5 + $0x624] sm:$0xf]  ;;  %v3789_v9 = vld [vmem:[#allocation5 + $0x630] sm:$0xf0]  ;;  %v4192_v11 = vor.u32 %v4705_v3, %v4189_v4  ;;  %v3491_v61 = vld [vmem:[#allocation5 + $0x3c8] sm:$0xf] }
  0xa1   :  { %2285 = vmatpush.bf16.msra.mxu1 %v4000_v12  ;;  %2298 = vmatpush.bf16.msra.mxu2 %v4128_v13  ;;  %v4637_v10 = vld [vmem:[#allocation5 + $0x724] sm:$0xf]  ;;  %v3917_v12 = vld [vmem:[#allocation5 + $0x730] sm:$0xf0]  ;;  %v4532_v62 = vld [vmem:[#allocation5 + $0x3d4] sm:$0xf0] }
  0xa2   :  { %2311 = vmatpush.bf16.msra.mxu3 %v4256_v17  ;;  %v4669_v13 = vld [vmem:[#allocation5 + $0x824] sm:$0xf]  ;;  %v4045_v14 = vld [vmem:[#allocation5 + $0x830] sm:$0xf0]  ;;  %v3792_v17 = vor.u32 %v4605_v8, %v3789_v9  ;;  %v3920_v25 = vor.u32 %v4637_v10, %v3917_v12  ;;  %v3091_v2 = vld [vmem:[#allocation5 + $0xa8] sm:$0xf] }
  0xa3   :  { %2273 = vmatpush.bf16.msra.mxu0 %v3856_v29  ;;  %v4701_v15 = vld [vmem:[#allocation5 + $0x924] sm:$0xf]  ;;  %v4173_v16 = vld [vmem:[#allocation5 + $0x930] sm:$0xf0]  ;;  %v4048_v27 = vor.u32 %v4669_v13, %v4045_v14  ;;  %v4432_v3 = vld [vmem:[#allocation5 + $0xb4] sm:$0xf0] }
  0xa4   :  { %v4601_v23 = vld [vmem:[#allocation5 + $0x604] sm:$0xf]  ;;  %v3773_v24 = vld [vmem:[#allocation5 + $0x610] sm:$0xf0]  ;;  %v3219_v4 = vld [vmem:[#allocation5 + $0x1a8] sm:$0xf] }
  0xa5   :  { %2286 = vmatpush.bf16.msra.mxu1 %v3984_v30  ;;  %2299 = vmatpush.bf16.msra.mxu2 %v4112_v31  ;;  %v4633_v28 = vld [vmem:[#allocation5 + $0x704] sm:$0xf]  ;;  %v3901_v29 = vld [vmem:[#allocation5 + $0x710] sm:$0xf0]  ;;  %v4176_v31 = vor.u32 %v4701_v15, %v4173_v16  ;;  %v3776_v39 = vor.u32 %v4601_v23, %v3773_v24  ;;  %v4496_v8 = vld [vmem:[#allocation5 + $0x2b4] sm:$0xf0] }
  0xa6   :  { %2312 = vmatpush.bf16.msra.mxu3 %v4240_v35  ;;  %v4665_v30 = vld [vmem:[#allocation5 + $0x804] sm:$0xf]  ;;  %v4029_v32 = vld [vmem:[#allocation5 + $0x810] sm:$0xf0]  ;;  %v3123_v35 = vld [vmem:[#allocation5 + $0xe8] sm:$0xf] }
  0xa7   :  { %2274 = vmatpush.bf16.msra.mxu0 %v3840_v45  ;;  %v4697_v33 = vld [vmem:[#allocation5 + $0x904] sm:$0xf]  ;;  %v4157_v34 = vld [vmem:[#allocation5 + $0x910] sm:$0xf0]  ;;  %v4504_v45 = vld [vmem:[#allocation5 + $0x2f4] sm:$0xf0] }
  0xa8   :  { %v4160_v50 = vor.u32 %v4697_v33, %v4157_v34  ;;  %v3380_v53 = vor.u32 %v4504_v45, %v3379_v43  ;;  %v3475_v9 = vld [vmem:[#allocation5 + $0x3a8] sm:$0xf]  ;;  %v4528_v10 = vld [vmem:[#allocation5 + $0x3b4] sm:$0xf0]  ;;  %v5040_v40 = vld [vmem:[#allocation7] sm:$0xf] }
  0xa9   :  { %2287 = vmatpush.bf16.msra.mxu1 %v3968_v46  ;;  %2300 = vmatpush.bf16.msra.mxu2 %v4096_v47  ;;  %v3904_v46 = vor.u32 %v4633_v28, %v3901_v29  ;;  %v4032_v47 = vor.u32 %v4665_v30, %v4029_v32  ;;  %v3075_v14 = vld [vmem:[#allocation5 + $0x88] sm:$0xf]  ;;  %v4428_v15 = vld [vmem:[#allocation5 + $0x94] sm:$0xf0] }
  0xaa   :  { %2313 = vmatpush.bf16.msra.mxu3 %v4224_v51  ;;  %v3124_v51 = vor.u32 %v4440_v36, %v3123_v35  ;;  %v3203_v16 = vld [vmem:[#allocation5 + $0x188] sm:$0xf]  ;;  %v4460_v23 = vld [vmem:[#allocation5 + $0x194] sm:$0xf0]  ;;  %v3076_v29 = vor.u32 %v4428_v15, %v3075_v14 }
  0xab   :  { %2275 = vmatpush.bf16.msra.mxu0 %v3824_v57  ;;  %v3508_v57 = vor.u32 %v4536_v49, %v3507_v48  ;;  %v3331_v24 = vld [vmem:[#allocation5 + $0x288] sm:$0xf]  ;;  %v4524_v28 = vld [vmem:[#allocation5 + $0x394] sm:$0xf0] }
  0xac   :  { %v3059_v30 = vld [vmem:[#allocation5 + $0x68] sm:$0xf]  ;;  %v4424_v33 = vld [vmem:[#allocation5 + $0x74] sm:$0xf0] }
  0xad   :  { %2288 = vmatpush.bf16.msra.mxu1 %v3952_v58  ;;  %2301 = vmatpush.bf16.msra.mxu2 %v4080_v59  ;;  %v4468_v58 = vld [vmem:[#allocation5 + $0x1d4] sm:$0xf0]  ;;  %v3363_v59 = vld [vmem:[#allocation5 + $0x2c8] sm:$0xf] }
  0xae   :  { %2314 = vmatpush.bf16.msra.mxu3 %v4208_v63  ;;  %v3108_v63 = vor.u32 %v4436_v55, %v3107_v54  ;;  %v3236_v0 = vor.u32 %v4468_v58, %v3235_v56  ;;  %v3364_v1 = vor.u32 %v4500_v60, %v3363_v59  ;;  %v3187_v34 = vld [vmem:[#allocation5 + $0x168] sm:$0xf]  ;;  %v4456_v35 = vld [vmem:[#allocation5 + $0x174] sm:$0xf0] }
  0xaf   :  { %2276 = vmatpush.bf16.msra.mxu0 %v3808_v5  ;;  %v3492_v5 = vor.u32 %v4532_v62, %v3491_v61  ;;  %v3315_v37 = vld [vmem:[#allocation5 + $0x268] sm:$0xf]  ;;  %v4520_v45 = vld [vmem:[#allocation5 + $0x374] sm:$0xf0]  ;;  %v3188_v48 = vor.u32 %v4456_v35, %v3187_v34 }
  0xb0   :  { %v3443_v43 = vld [vmem:[#allocation5 + $0x368] sm:$0xf]  ;;  %v4452_v54 = vld [vmem:[#allocation5 + $0x154] sm:$0xf0] }
  0xb1   :  { %2289 = vmatpush.bf16.msra.mxu1 %v3936_v6  ;;  %2302 = vmatpush.bf16.msra.mxu2 %v4064_v7  ;;  %v4464_v6 = vld [vmem:[#allocation5 + $0x1b4] sm:$0xf0]  ;;  %v3347_v7 = vld [vmem:[#allocation5 + $0x2a8] sm:$0xf] }
  0xb2   :  { %2315 = vmatpush.bf16.msra.mxu3 %v4192_v11  ;;  %v3092_v11 = vor.u32 %v4432_v3, %v3091_v2  ;;  %v3220_v12 = vor.u32 %v4464_v6, %v3219_v4  ;;  %v3348_v13 = vor.u32 %v4496_v8, %v3347_v7  ;;  %v3299_v55 = vld [vmem:[#allocation5 + $0x248] sm:$0xf]  ;;  %v4484_v56 = vld [vmem:[#allocation5 + $0x254] sm:$0xf0] }
  0xb3   :  { %2277 = vmatpush.bf16.msra.mxu0 %v3792_v17  ;;  %v3476_v17 = vor.u32 %v4528_v10, %v3475_v9  ;;  %v4516_v58 = vld [vmem:[#allocation5 + $0x354] sm:$0xf0]  ;;  %v3300_v62 = vor.u32 %v4484_v56, %v3299_v55  ;;  %v3283_v6 = vld [vmem:[#allocation5 + $0x228] sm:$0xf] }
  0xb4   :  { %v4480_v7 = vld [vmem:[#allocation5 + $0x234] sm:$0xf0]  ;;  %v3411_v8 = vld [vmem:[#allocation5 + $0x328] sm:$0xf] }
  0xb5   :  { %2290 = vmatpush.bf16.msra.mxu1 %v3920_v25  ;;  %2303 = vmatpush.bf16.msra.mxu2 %v4048_v27  ;;  %v4492_v25 = vld [vmem:[#allocation5 + $0x294] sm:$0xf0]  ;;  %v3459_v27 = vld [vmem:[#allocation5 + $0x388] sm:$0xf]  ;;  %v3284_v15 = vor.u32 %v4480_v7, %v3283_v6 }
  0xb6   :  { %2316 = vmatpush.bf16.msra.mxu3 %v4176_v31  ;;  %v3204_v31 = vor.u32 %v4460_v23, %v3203_v16  ;;  %v3332_v32 = vor.u32 %v4492_v25, %v3331_v24  ;;  %v3460_v36 = vor.u32 %v4524_v28, %v3459_v27  ;;  %v2072_v60 = vpop.f32.mrf.mxu0  ;;  %v4512_v9 = vld [vmem:[#allocation5 + $0x334] sm:$0xf0]  ;;  %v3139_v16 = vld [vmem:[#allocation5 + $0x108] sm:$0xf] }
  0xb7   :  { %2278 = vmatpush.bf16.msra.mxu0 %v3776_v39  ;;  %v4488_v39 = vld [vmem:[#allocation5 + $0x274] sm:$0xf0]  ;;  %v2085_v3 = vpop.f32.mrf.mxu1  ;;  %v3267_v23 = vld [vmem:[#allocation5 + $0x208] sm:$0xf]  ;;  %v3412_v25 = vor.u32 %v4512_v9, %v3411_v8 }
  0xb8   :  { %v3316_v49 = vor.u32 %v4488_v39, %v3315_v37  ;;  %v4476_v27 = vld [vmem:[#allocation5 + $0x214] sm:$0xf0]  ;;  %v3395_v28 = vld [vmem:[#allocation5 + $0x308] sm:$0xf] }
  0xb9   :  { %2291 = vmatpush.bf16.msra.mxu1 %v3904_v46  ;;  %2304 = vmatpush.bf16.msra.mxu2 %v4032_v47  ;;  %v3060_v46 = vor.u32 %v4424_v33, %v3059_v30  ;;  %v3043_v47 = vld [vmem:[#allocation5 + $0x48] sm:$0xf]  ;;  %v4568_v33 = vld [vmem:[#allocation5 + $0x4f4] sm:$0xf0] }
  0xba   :  { %2317 = vmatpush.bf16.msra.mxu3 %v4160_v50  ;;  %2279 = vmatmul.bf16.vlgmr.msra.gmra.mxu0 %v5012_v38  ;;  %v4420_v50 = vld [vmem:[#allocation5 + $0x54] sm:$0xf0]  ;;  %v3763_v34 = vld [vmem:[#allocation5 + $0x5e8] sm:$0xf] }
  0xbb   :  { %2323 = vmatpush.bf16.msrb.mxu0 %v3124_v51  ;;  %v3171_v51 = vld [vmem:[#allocation5 + $0x148] sm:$0xf]  ;;  %v3044_v59 = vor.u32 %v4420_v50, %v3043_v47  ;;  %v4632_v39 = vld [vmem:[#allocation5 + $0x6f4] sm:$0xf0]  ;;  %v3268_v47 = vor.u32 %v4476_v27, %v3267_v23 }
  0xbc   :  { %2305 = vmatmul.bf16.vlgmr.msra.gmra.mxu2 %v5024_v21  ;;  %2292 = vmatmul.bf16.vlgmr.msra.gmra.mxu1 %v5016_v42  ;;  %v3172_v61 = vor.u32 %v4452_v54, %v3171_v51  ;;  %v3891_v37 = vld [vmem:[#allocation5 + $0x6e8] sm:$0xf]  ;;  %v4564_v56 = vld [vmem:[#allocation5 + $0x4d4] sm:$0xf0] }
  0xbd   :  { %2336 = vmatpush.bf16.msrb.mxu1 %v3252_v52  ;;  %2349 = vmatpush.bf16.msrb.mxu2 %v3380_v53  ;;  %v420_v52 = vperm.slane %v5040_v40, 0  ;;  %v3444_v53 = vor.u32 %v4520_v45, %v3443_v43  ;;  %v3892_v54 = vor.u32 %v4632_v39, %v3891_v37  ;;  %v3619_v55 = vld [vmem:[#allocation5 + $0x4c8] sm:$0xf]  ;;  %v4560_v6 = vld [vmem:[#allocation5 + $0x4b4] sm:$0xf0] }
  0xbe   :  { %2362 = vmatpush.bf16.msrb.mxu3 %v3508_v57  ;;  %v3427_v57 = vld [vmem:[#allocation5 + $0x348] sm:$0xf]  ;;  %v2074_v45 = vpop.f32.mrf.mxu0  ;;  %v4592_v9 = vld [vmem:[#allocation5 + $0x5b4] sm:$0xf0] }
  0xbf   :  { %2318 = vmatmul.bf16.vlgmr.msra.gmra.mxu3 %v5026_v26  ;;  %2324 = vmatpush.bf16.msrb.mxu0 %v3108_v63  ;;  %v3027_v63 = vld [vmem:[#allocation5 + $0x28] sm:$0xf]  ;;  %v2073_v2 = vadd.f32 %v2072_v60, %v420_v52  ;;  %v3428_v4 = vor.u32 %v4516_v58, %v3427_v57  ;;  %v2087_v50 = vpop.f32.mrf.mxu1  ;;  %v4556_v23 = vld [vmem:[#allocation5 + $0x494] sm:$0xf0] }
  0xc0   :  { %v3747_v57 = vld [vmem:[#allocation5 + $0x5c8] sm:$0xf]  ;;  %v4588_v27 = vld [vmem:[#allocation5 + $0x594] sm:$0xf0] }
  0xc1   :  { %2337 = vmatpush.bf16.msrb.mxu1 %v3236_v0  ;;  %2350 = vmatpush.bf16.msrb.mxu2 %v3364_v1  ;;  %v4416_v0 = vld [vmem:[#allocation5 + $0x34] sm:$0xf0]  ;;  %v3155_v1 = vld [vmem:[#allocation5 + $0x128] sm:$0xf]  ;;  %v2086_v10 = vadd.f32 %v2085_v3, %v2073_v2 }
  0xc2   :  { %2363 = vmatpush.bf16.msrb.mxu3 %v3492_v5  ;;  %v4448_v5 = vld [vmem:[#allocation5 + $0x134] sm:$0xf0]  ;;  %v3875_v60 = vld [vmem:[#allocation5 + $0x6c8] sm:$0xf] }
  0xc3   :  { %2325 = vmatpush.bf16.msrb.mxu0 %v3092_v11  ;;  %v3028_v11 = vor.u32 %v4416_v0, %v3027_v63  ;;  %v3156_v14 = vor.u32 %v4448_v5, %v3155_v1  ;;  %v4660_v63 = vld [vmem:[#allocation5 + $0x7d4] sm:$0xf0]  ;;  %v3620_v1 = vor.u32 %v4564_v56, %v3619_v55  ;;  %v3603_v5 = vld [vmem:[#allocation5 + $0x4a8] sm:$0xf] }
  0xc4   :  { %v3731_v7 = vld [vmem:[#allocation5 + $0x5a8] sm:$0xf]  ;;  %v4552_v37 = vld [vmem:[#allocation5 + $0x474] sm:$0xf0] }
  0xc5   :  { %2338 = vmatpush.bf16.msrb.mxu1 %v3220_v12  ;;  %2351 = vmatpush.bf16.msrb.mxu2 %v3348_v13  ;;  %v3011_v12 = vld [vmem:[#allocation5 + $0x8] sm:$0xf]  ;;  %v4412_v13 = vld [vmem:[#allocation5 + $0x14] sm:$0xf0] }
  0xc6   :  { %2364 = vmatpush.bf16.msrb.mxu3 %v3476_v17  ;;  %v4444_v17 = vld [vmem:[#allocation5 + $0x114] sm:$0xf0]  ;;  %v3012_v35 = vor.u32 %v4412_v13, %v3011_v12  ;;  %v3987_v12 = vld [vmem:[#allocation5 + $0x7a8] sm:$0xf] }
  0xc7   :  { %2326 = vmatpush.bf16.msrb.mxu0 %v3076_v29  ;;  %v4508_v29 = vld [vmem:[#allocation5 + $0x314] sm:$0xf0]  ;;  %v3699_v39 = vld [vmem:[#allocation5 + $0x568] sm:$0xf] }
  0xc8   :  { %v3396_v51 = vor.u32 %v4508_v29, %v3395_v28  ;;  %v4656_v13 = vld [vmem:[#allocation5 + $0x7b4] sm:$0xf0]  ;;  %v3843_v28 = vld [vmem:[#allocation5 + $0x688] sm:$0xf] }
  0xc9   :  { %2339 = vmatpush.bf16.msrb.mxu1 %v3204_v31  ;;  %2352 = vmatpush.bf16.msrb.mxu2 %v3332_v32  ;;  %v3635_v32 = vld [vmem:[#allocation5 + $0x4e8] sm:$0xf]  ;;  %v4620_v29 = vld [vmem:[#allocation5 + $0x694] sm:$0xf0] }
  0xca   :  { %2365 = vmatpush.bf16.msrb.mxu3 %v3460_v36  ;;  %v4600_v36 = vld [vmem:[#allocation5 + $0x5f4] sm:$0xf0]  ;;  %v3636_v52 = vor.u32 %v4568_v33, %v3635_v32 }
  0xcb   :  { %2327 = vmatpush.bf16.msrb.mxu0 %v3060_v46  ;;  %v2098_v24 = vpop.f32.mrf.mxu2  ;;  %v2111_v31 = vpop.f32.mrf.mxu3  ;;  %v3140_v46 = vor.u32 %v4444_v17, %v3139_v16  ;;  %v3587_v17 = vld [vmem:[#allocation5 + $0x488] sm:$0xf]  ;;  %v4616_v50 = vld [vmem:[#allocation5 + $0x674] sm:$0xf0] }
  0xcc   :  { %v2099_v30 = vadd.f32 %v2098_v24, %v2086_v10  ;;  %v3859_v10 = vld [vmem:[#allocation5 + $0x6a8] sm:$0xf]  ;;  %v3588_v32 = vor.u32 %v4556_v23, %v3587_v17  ;;  %v4640_v23 = vld [vmem:[#allocation5 + $0x734] sm:$0xf0] }
  0xcd   :  { %2340 = vmatpush.bf16.msrb.mxu1 %v3188_v48  ;;  %2353 = vmatpush.bf16.msrb.mxu2 %v3316_v49  ;;  %v4019_v48 = vld [vmem:[#allocation5 + $0x7e8] sm:$0xf]  ;;  %v4664_v49 = vld [vmem:[#allocation5 + $0x7f4] sm:$0xf0] }
  0xce   :  { %2366 = vmatpush.bf16.msrb.mxu3 %v3444_v53  ;;  %v5043_v43 = vadd.f32 %v2111_v31, %v2099_v30  ;;  %v3764_v53 = vor.u32 %v4600_v36, %v3763_v34  ;;  %v4020_v58 = vor.u32 %v4664_v49, %v4019_v48  ;;  %v3715_v24 = vld [vmem:[#allocation5 + $0x588] sm:$0xf]  ;;  %v4652_v31 = vld [vmem:[#allocation5 + $0x794] sm:$0xf0] }
  0xcf   :  { %2328 = vmatpush.bf16.msrb.mxu0 %v3044_v59  ;;  %v4596_v59 = vld [vmem:[#allocation5 + $0x5d4] sm:$0xf0]  ;;  %v3971_v30 = vld [vmem:[#allocation5 + $0x788] sm:$0xf]  ;;  %v3716_v34 = vor.u32 %v4588_v27, %v3715_v24 }
  0xd0   :  { %v3748_v3 = vor.u32 %v4596_v59, %v3747_v57  ;;  %v3571_v36 = vld [vmem:[#allocation5 + $0x468] sm:$0xf]  ;;  %v4584_v48 = vld [vmem:[#allocation5 + $0x574] sm:$0xf0] }
  0xd1   :  { %2341 = vmatpush.bf16.msrb.mxu1 %v3172_v61  ;;  %2354 = vmatpush.bf16.msrb.mxu2 %v3300_v62  ;;  %v4628_v61 = vld [vmem:[#allocation5 + $0x6d4] sm:$0xf0]  ;;  %v4003_v62 = vld [vmem:[#allocation5 + $0x7c8] sm:$0xf]  ;;  %v3700_v55 = vor.u32 %v4584_v48, %v3699_v39 }
  0xd2   :  { %2367 = vmatpush.bf16.msrb.mxu3 %v3428_v4  ;;  %v3876_v4 = vor.u32 %v4628_v61, %v3875_v60  ;;  %v4004_v8 = vor.u32 %v4660_v63, %v4003_v62  ;;  %v3827_v49 = vld [vmem:[#allocation5 + $0x668] sm:$0xf]  ;;  %v4580_v61 = vld [vmem:[#allocation5 + $0x554] sm:$0xf0] }
  0xd3   :  { %2329 = vmatpush.bf16.msrb.mxu0 %v3028_v11  ;;  %v2100_v0 = vpop.f32.mrf.mxu2  ;;  %v2113_v2 = vpop.f32.mrf.mxu3  ;;  %v4624_v11 = vld [vmem:[#allocation5 + $0x6b4] sm:$0xf0]  ;;  %v3828_v56 = vor.u32 %v4616_v50, %v3827_v49  ;;  %v3555_v57 = vld [vmem:[#allocation5 + $0x448] sm:$0xf]  ;;  %v4438_v50 = vld [vmem:[#allocation5 + $0xec] sm:$0xf] }
  0xd4   :  { %v3860_v16 = vor.u32 %v4624_v11, %v3859_v10  ;;  %v3683_v59 = vld [vmem:[#allocation5 + $0x548] sm:$0xf]  ;;  %v4612_v63 = vld [vmem:[#allocation5 + $0x654] sm:$0xf0] }
  0xd5   :  { %2342 = vmatpush.bf16.msrb.mxu1 %v3156_v14  ;;  %2355 = vmatpush.bf16.msrb.mxu2 %v3284_v15  ;;  %v3604_v14 = vor.u32 %v4560_v6, %v3603_v5  ;;  %v3732_v15 = vor.u32 %v4592_v9, %v3731_v7  ;;  %v3811_v62 = vld [vmem:[#allocation5 + $0x648] sm:$0xf]  ;;  %v3684_v7 = vor.u32 %v4580_v61, %v3683_v59  ;;  %v4544_v10 = vld [vmem:[#allocation5 + $0x434] sm:$0xf0] }
  0xd6   :  { %2368 = vmatpush.bf16.msrb.mxu3 %v3412_v25  ;;  %v3988_v25 = vor.u32 %v4656_v13, %v3987_v12  ;;  %v3939_v2 = vld [vmem:[#allocation5 + $0x748] sm:$0xf]  ;;  %v4540_v27 = vld [vmem:[#allocation5 + $0x414] sm:$0xf0] }
  0xd7   :  { %2330 = vmatpush.bf16.msrb.mxu0 %v3012_v35  ;;  %v2124_v33 = vpop.f32.mrf.mxu0  ;;  %v3844_v35 = vor.u32 %v4620_v29, %v3843_v28  ;;  %v3539_v9 = vld [vmem:[#allocation5 + $0x428] sm:$0xf]  ;;  %v4728_v49 = vld [vmem:[#allocation5 + $0x9f4] sm:$0xf0] }
  0xd8   :  { %v2125_v45 = vadd.f32 %v2124_v33, %v5043_v43  ;;  %v3667_v11 = vld [vmem:[#allocation5 + $0x528] sm:$0xf]  ;;  %v3540_v24 = vor.u32 %v4544_v10, %v3539_v9  ;;  %v4688_v9 = vld [vmem:[#allocation5 + $0x8b4] sm:$0xf0] }
  0xd9   :  { %2343 = vmatpush.bf16.msrb.mxu1 %v3140_v46  ;;  %2356 = vmatpush.bf16.msrb.mxu2 %v3268_v47  ;;  %v2137_v46 = vpop.f32.mrf.mxu1  ;;  %v3972_v47 = vor.u32 %v4652_v31, %v3971_v30  ;;  %v3923_v17 = vld [vmem:[#allocation5 + $0x728] sm:$0xf]  ;;  %v4572_v31 = vld [vmem:[#allocation5 + $0x514] sm:$0xf0] }
  0xda   :  { %2369 = vmatpush.bf16.msrb.mxu3 %v3396_v51  ;;  %2331 = vmatmul.bf16.vlgmr.msrb.gmra.mxu0 %v5002_v19  ;;  %v3955_v51 = vld [vmem:[#allocation5 + $0x768] sm:$0xf] }
  0xdb   :  { %2375 = vmatpush.bf16.msra.mxu0 %v3636_v52  ;;  %v4648_v52 = vld [vmem:[#allocation5 + $0x774] sm:$0xf0]  ;;  %v3651_v30 = vld [vmem:[#allocation5 + $0x508] sm:$0xf] }
  0xdc   :  { %2357 = vmatmul.bf16.vlgmr.msrb.gmra.mxu2 %v5000_v18  ;;  %2344 = vmatmul.bf16.vlgmr.msrb.gmra.mxu1 %v5006_v22  ;;  %v3956_v43 = vor.u32 %v4648_v52, %v3955_v51  ;;  %v3125_v51 = vld [vmem:[#allocation5 + $0xf8] sm:$0xf0]  ;;  %v3652_v52 = vor.u32 %v4572_v31, %v3651_v30  ;;  %v4259_v61 = vld [vmem:[#allocation5 + $0x9c8] sm:$0xf]  ;;  %v4716_v30 = vld [vmem:[#allocation5 + $0x994] sm:$0xf0] }
  0xdd   :  { %2388 = vmatpush.bf16.msra.mxu1 %v3764_v53  ;;  %2401 = vmatpush.bf16.msra.mxu2 %v3892_v54  ;;  %v2138_v53 = vadd.f32 %v2137_v46, %v2125_v45  ;;  %v3572_v54 = vor.u32 %v4552_v37, %v3571_v36  ;;  %v3907_v36 = vld [vmem:[#allocation5 + $0x708] sm:$0xf]  ;;  %v4636_v37 = vld [vmem:[#allocation5 + $0x714] sm:$0xf0]  ;;  %v3128_v59 = vor.u32 %v4438_v50, %v3125_v51  ;;  %v4426_v31 = vld [vmem:[#allocation5 + $0x8c] sm:$0xf] }
  0xde   :  { %2414 = vmatpush.bf16.msra.mxu3 %v4020_v58  ;;  %v4548_v58 = vld [vmem:[#allocation5 + $0x454] sm:$0xf0]  ;;  %v4147_v45 = vld [vmem:[#allocation5 + $0x8e8] sm:$0xf] }
  0xdf   :  { %2370 = vmatmul.bf16.vlgmr.msrb.gmra.mxu3 %v5004_v20  ;;  %2376 = vmatpush.bf16.msra.mxu0 %v3620_v1  ;;  %v2150_v60 = vpop.f32.mrf.mxu2  ;;  %v2126_v6 = vpop.f32.mrf.mxu0  ;;  %v4696_v46 = vld [vmem:[#allocation5 + $0x8f4] sm:$0xf0]  ;;  %v4243_v10 = vld [vmem:[#allocation5 + $0x9a8] sm:$0xf] }
  0xe0   :  { %v2151_v0 = vadd.f32 %v2150_v60, %v2138_v53  ;;  %v4131_v60 = vld [vmem:[#allocation5 + $0x8c8] sm:$0xf] }
  0xe1   :  { %2389 = vmatpush.bf16.msra.mxu1 %v3748_v3  ;;  %2402 = vmatpush.bf16.msra.mxu2 %v3876_v4  ;;  %v4644_v3 = vld [vmem:[#allocation5 + $0x754] sm:$0xf0]  ;;  %v3556_v4 = vor.u32 %v4548_v58, %v3555_v57  ;;  %v2139_v12 = vpop.f32.mrf.mxu1  ;;  %v4148_v57 = vor.u32 %v4696_v46, %v4147_v45 }
  0xe2   :  { %2415 = vmatpush.bf16.msra.mxu3 %v4004_v8  ;;  %v2163_v1 = vpop.f32.mrf.mxu3  ;;  %v3812_v8 = vor.u32 %v4612_v63, %v3811_v62  ;;  %v3940_v13 = vor.u32 %v4644_v3, %v3939_v2  ;;  %v4724_v63 = vld [vmem:[#allocation5 + $0x9d4] sm:$0xf0]  ;;  %v4466_v2 = vld [vmem:[#allocation5 + $0x1cc] sm:$0xf]  ;;  %v3237_v3 = vld [vmem:[#allocation5 + $0x1d8] sm:$0xf0] }
  0xe3   :  { %2377 = vmatpush.bf16.msra.mxu0 %v3604_v14  ;;  %v5050_v5 = vadd.f32 %v2163_v1, %v2151_v0  ;;  %v4576_v14 = vld [vmem:[#allocation5 + $0x534] sm:$0xf0]  ;;  %v4434_v0 = vld [vmem:[#allocation5 + $0xcc] sm:$0xf]  ;;  %v3109_v1 = vld [vmem:[#allocation5 + $0xd8] sm:$0xf0]  ;;  %v4260_v6 = vor.u32 %v4724_v63, %v4259_v61 }
  0xe4   :  { %v3668_v28 = vor.u32 %v4576_v14, %v3667_v11  ;;  %v3240_v11 = vor.u32 %v4466_v2, %v3237_v3  ;;  %v4720_v12 = vld [vmem:[#allocation5 + $0x9b4] sm:$0xf0]  ;;  %v3093_v14 = vld [vmem:[#allocation5 + $0xb8] sm:$0xf0]  ;;  %v4418_v63 = vld [vmem:[#allocation5 + $0x4c] sm:$0xf] }
  0xe5   :  { %2390 = vmatpush.bf16.msra.mxu1 %v3732_v15  ;;  %2403 = vmatpush.bf16.msra.mxu2 %v3860_v16  ;;  %v3795_v15 = vld [vmem:[#allocation5 + $0x628] sm:$0xf]  ;;  %v4608_v16 = vld [vmem:[#allocation5 + $0x634] sm:$0xf0]  ;;  %v4450_v2 = vld [vmem:[#allocation5 + $0x14c] sm:$0xf] }
  0xe6   :  { %2416 = vmatpush.bf16.msra.mxu3 %v3988_v25  ;;  %v3523_v25 = vld [vmem:[#allocation5 + $0x408] sm:$0xf]  ;;  %v3796_v29 = vor.u32 %v4608_v16, %v3795_v15  ;;  %v4462_v15 = vld [vmem:[#allocation5 + $0x1ac] sm:$0xf]  ;;  %v3221_v16 = vld [vmem:[#allocation5 + $0x1b8] sm:$0xf0] }
  0xe7   :  { %2378 = vmatpush.bf16.msra.mxu0 %v3588_v32  ;;  %v3779_v32 = vld [vmem:[#allocation5 + $0x608] sm:$0xf]  ;;  %v2152_v33 = vpop.f32.mrf.mxu2  ;;  %v3524_v48 = vor.u32 %v4540_v27, %v3523_v25  ;;  %v4684_v27 = vld [vmem:[#allocation5 + $0x894] sm:$0xf0]  ;;  %v3173_v3 = vld [vmem:[#allocation5 + $0x158] sm:$0xf0] }
  0xe8   :  { %v4099_v25 = vld [vmem:[#allocation5 + $0x888] sm:$0xf] }
  0xe9   :  { %2391 = vmatpush.bf16.msra.mxu1 %v3716_v34  ;;  %2404 = vmatpush.bf16.msra.mxu2 %v3844_v35  ;;  %v3924_v34 = vor.u32 %v4640_v23, %v3923_v17  ;;  %v4604_v35 = vld [vmem:[#allocation5 + $0x614] sm:$0xf0]  ;;  %v4244_v23 = vor.u32 %v4720_v12, %v4243_v10 }
  0xea   :  { %2417 = vmatpush.bf16.msra.mxu3 %v3972_v47  ;;  %v2165_v39 = vpop.f32.mrf.mxu3  ;;  %v4275_v47 = vld [vmem:[#allocation5 + $0x9e8] sm:$0xf]  ;;  %v3780_v53 = vor.u32 %v4604_v35, %v3779_v32  ;;  %v3077_v32 = vld [vmem:[#allocation5 + $0x98] sm:$0xf0]  ;;  %v4672_v12 = vld [vmem:[#allocation5 + $0x834] sm:$0xf0] }
  0xeb   :  { %2379 = vmatpush.bf16.msra.mxu0 %v3572_v54  ;;  %v4470_v54 = vld [vmem:[#allocation5 + $0x1ec] sm:$0xf]  ;;  %v4276_v58 = vor.u32 %v4728_v49, %v4275_v47  ;;  %v3205_v35 = vld [vmem:[#allocation5 + $0x198] sm:$0xf0]  ;;  %v3080_v46 = vor.u32 %v4426_v31, %v3077_v32  ;;  %v4083_v47 = vld [vmem:[#allocation5 + $0x868] sm:$0xf] }
  0xec   :  { %v4211_v49 = vld [vmem:[#allocation5 + $0x968] sm:$0xf]  ;;  %v4700_v32 = vld [vmem:[#allocation5 + $0x914] sm:$0xf0] }
  0xed   :  { %2392 = vmatpush.bf16.msra.mxu1 %v3700_v55  ;;  %2405 = vmatpush.bf16.msra.mxu2 %v3828_v56  ;;  %v3253_v55 = vld [vmem:[#allocation5 + $0x1f8] sm:$0xf0]  ;;  %v3908_v56 = vor.u32 %v4636_v37, %v3907_v36  ;;  %v4100_v37 = vor.u32 %v4684_v27, %v4099_v25  ;;  %v4035_v27 = vld [vmem:[#allocation5 + $0x808] sm:$0xf] }
  0xee   :  { %2418 = vmatpush.bf16.msra.mxu3 %v3956_v43  ;;  %v4692_v43 = vld [vmem:[#allocation5 + $0x8d4] sm:$0xf0]  ;;  %v3256_v62 = vor.u32 %v4470_v54, %v3253_v55  ;;  %v3061_v54 = vld [vmem:[#allocation5 + $0x78] sm:$0xf0]  ;;  %v4454_v55 = vld [vmem:[#allocation5 + $0x16c] sm:$0xf] }
  0xef   :  { %2380 = vmatpush.bf16.msra.mxu0 %v3556_v4  ;;  %v4132_v4 = vor.u32 %v4692_v43, %v4131_v60  ;;  %v4676_v60 = vld [vmem:[#allocation5 + $0x854] sm:$0xf0]  ;;  %v4195_v43 = vld [vmem:[#allocation5 + $0x948] sm:$0xf] }
  0xf0   :  { %v4163_v31 = vld [vmem:[#allocation5 + $0x908] sm:$0xf] }
  0xf1   :  { %2393 = vmatpush.bf16.msra.mxu1 %v3684_v7  ;;  %2406 = vmatpush.bf16.msra.mxu2 %v3812_v8  ;;  %v3112_v7 = vor.u32 %v4434_v0, %v3109_v1  ;;  %v4115_v8 = vld [vmem:[#allocation5 + $0x8a8] sm:$0xf]  ;;  %v3045_v0 = vld [vmem:[#allocation5 + $0x58] sm:$0xf0] }
  0xf2   :  { %2419 = vmatpush.bf16.msra.mxu3 %v3940_v13  ;;  %v4430_v13 = vld [vmem:[#allocation5 + $0xac] sm:$0xf]  ;;  %v4116_v17 = vor.u32 %v4688_v9, %v4115_v8  ;;  %v3048_v10 = vor.u32 %v4418_v63, %v3045_v0  ;;  %v3493_v0 = vld [vmem:[#allocation5 + $0x3d8] sm:$0xf0] }
  0xf3   :  { %2381 = vmatpush.bf16.msra.mxu0 %v3540_v24  ;;  %v3096_v24 = vor.u32 %v4430_v13, %v3093_v14  ;;  %v4179_v13 = vld [vmem:[#allocation5 + $0x928] sm:$0xf]  ;;  %v3176_v14 = vor.u32 %v4450_v2, %v3173_v3  ;;  %v4562_v2 = vld [vmem:[#allocation5 + $0x4cc] sm:$0xf]  ;;  %v3621_v3 = vld [vmem:[#allocation5 + $0x4d8] sm:$0xf0] }
  0xf5   :  { %2394 = vmatpush.bf16.msra.mxu1 %v3668_v28  ;;  %2407 = vmatpush.bf16.msra.mxu2 %v3796_v29  ;;  %v4227_v28 = vld [vmem:[#allocation5 + $0x988] sm:$0xf]  ;;  %v3224_v29 = vor.u32 %v4462_v15, %v3221_v16  ;;  %v4704_v15 = vld [vmem:[#allocation5 + $0x934] sm:$0xf0]  ;;  %v4414_v16 = vld [vmem:[#allocation5 + $0x2c] sm:$0xf] }
  0xf6   :  { %2420 = vmatpush.bf16.msra.mxu3 %v3924_v34  ;;  %v4458_v34 = vld [vmem:[#allocation5 + $0x18c] sm:$0xf]  ;;  %v4228_v45 = vor.u32 %v4716_v30, %v4227_v28  ;;  %v4668_v28 = vld [vmem:[#allocation5 + $0x814] sm:$0xf0] }
  0xf7   :  { %2382 = vmatpush.bf16.msra.mxu0 %v3524_v48  ;;  %v2176_v33 = vpop.f32.mrf.mxu0  ;;  %v4680_v48 = vld [vmem:[#allocation5 + $0x874] sm:$0xf0]  ;;  %v3208_v50 = vor.u32 %v4458_v34, %v3205_v35  ;;  %v3013_v35 = vld [vmem:[#allocation5 + $0x18] sm:$0xf0] }
  0xf8   :  { %v2177_v36 = vadd.f32 %v2176_v33, %v5050_v5  ;;  %v4084_v5 = vor.u32 %v4680_v48, %v4083_v47  ;;  %v4410_v33 = vld [vmem:[#allocation5 + $0xc] sm:$0xf] }
  0xf9   :  { %2395 = vmatpush.bf16.msra.mxu1 %v3652_v52  ;;  %2408 = vmatpush.bf16.msra.mxu2 %v3780_v53  ;;  %v2189_v39 = vpop.f32.mrf.mxu1  ;;  %v4712_v52 = vld [vmem:[#allocation5 + $0x974] sm:$0xf0]  ;;  %v4422_v53 = vld [vmem:[#allocation5 + $0x6c] sm:$0xf] }
  0xfa   :  { %2421 = vmatpush.bf16.msra.mxu3 %v3908_v56  ;;  %2383 = vmatmul.bf16.vlgmr.msra.gmra.mxu0 %v5014_v41  ;;  %v5057_v51 = vadd.f32 %v2189_v39, %v2177_v36  ;;  %v3189_v56 = vld [vmem:[#allocation5 + $0x178] sm:$0xf0]  ;;  %v4442_v36 = vld [vmem:[#allocation5 + $0x10c] sm:$0xf] }
  0xfb   :  { %2427 = vmatpush.bf16.msrb.mxu0 %v4148_v57  ;;  %v4212_v57 = vor.u32 %v4712_v52, %v4211_v49  ;;  %v3192_v61 = vor.u32 %v4454_v55, %v3189_v56  ;;  %v4534_v47 = vld [vmem:[#allocation5 + $0x3ec] sm:$0xf]  ;;  %v4036_v49 = vor.u32 %v4668_v28, %v4035_v27  ;;  %v3016_v55 = vor.u32 %v4410_v33, %v3013_v35  ;;  %v3461_v33 = vld [vmem:[#allocation5 + $0x398] sm:$0xf0] }
  0xfc   :  { %2409 = vmatmul.bf16.vlgmr.msra.gmra.mxu2 %v5012_v38  ;;  %2396 = vmatmul.bf16.vlgmr.msra.gmra.mxu1 %v5018_v44  ;;  %v4566_v52 = vld [vmem:[#allocation5 + $0x4ec] sm:$0xf]  ;;  %v3589_v35 = vld [vmem:[#allocation5 + $0x498] sm:$0xf0] }
  0xfd   :  { %2440 = vmatpush.bf16.msrb.mxu1 %v4276_v58  ;;  %2453 = vmatpush.bf16.msrb.mxu2 %v3128_v59  ;;  %v3064_v58 = vor.u32 %v4422_v53, %v3061_v54  ;;  %v4067_v59 = vld [vmem:[#allocation5 + $0x848] sm:$0xf]  ;;  %v3637_v53 = vld [vmem:[#allocation5 + $0x4f8] sm:$0xf0]  ;;  %v4164_v54 = vor.u32 %v4700_v32, %v4163_v31  ;;  %v4598_v56 = vld [vmem:[#allocation5 + $0x5ec] sm:$0xf] }
  0xfe   :  { %2466 = vmatpush.bf16.msrb.mxu3 %v3256_v62  ;;  %v4708_v62 = vld [vmem:[#allocation5 + $0x954] sm:$0xf0]  ;;  %v4522_v31 = vld [vmem:[#allocation5 + $0x38c] sm:$0xf] }
  0xff   :  { %2422 = vmatmul.bf16.vlgmr.msra.gmra.mxu3 %v5016_v42  ;;  %2428 = vmatpush.bf16.msrb.mxu0 %v4132_v4  ;;  %v5059_v1 = vpop.f32.mrf.mxu2  ;;  %v4196_v9 = vor.u32 %v4708_v62, %v4195_v43  ;;  %v4498_v43 = vld [vmem:[#allocation5 + $0x2cc] sm:$0xf] }
 0x100   :  { %v4530_v62 = vld [vmem:[#allocation5 + $0x3cc] sm:$0xf] }
 0x101   :  { %2441 = vmatpush.bf16.msrb.mxu1 %v4260_v6  ;;  %2454 = vmatpush.bf16.msrb.mxu2 %v3112_v7  ;;  %v2178_v6 = vpop.f32.mrf.mxu0  ;;  %v4068_v7 = vor.u32 %v4676_v60, %v4067_v59  ;;  %v2191_v8 = vpop.f32.mrf.mxu1  ;;  %v3640_v60 = vor.u32 %v4566_v52, %v3637_v53  ;;  %v3445_v52 = vld [vmem:[#allocation5 + $0x378] sm:$0xf0]  ;;  %v4550_v53 = vld [vmem:[#allocation5 + $0x46c] sm:$0xf] }
 0x102   :  { %2467 = vmatpush.bf16.msrb.mxu3 %v3240_v11  ;;  %v5061_v4 = vpop.f32.mrf.mxu3  ;;  %v4051_v11 = vld [vmem:[#allocation5 + $0x828] sm:$0xf]  ;;  %v4594_v6 = vld [vmem:[#allocation5 + $0x5cc] sm:$0xf] }
 0x103   :  { %2429 = vmatpush.bf16.msrb.mxu0 %v4116_v17  ;;  %v3029_v17 = vld [vmem:[#allocation5 + $0x38] sm:$0xf0]  ;;  %v4052_v25 = vor.u32 %v4672_v12, %v4051_v11  ;;  %v4494_v11 = vld [vmem:[#allocation5 + $0x2ac] sm:$0xf] }
 0x104   :  { %v3032_v30 = vor.u32 %v4414_v16, %v3029_v17  ;;  %v3349_v12 = vld [vmem:[#allocation5 + $0x2b8] sm:$0xf0]  ;;  %v4558_v16 = vld [vmem:[#allocation5 + $0x4ac] sm:$0xf] }
 0x105   :  { %2442 = vmatpush.bf16.msrb.mxu1 %v4244_v23  ;;  %2455 = vmatpush.bf16.msrb.mxu2 %v3096_v24  ;;  %v4446_v23 = vld [vmem:[#allocation5 + $0x12c] sm:$0xf]  ;;  %v3157_v24 = vld [vmem:[#allocation5 + $0x138] sm:$0xf0] }
 0x106   :  { %2468 = vmatpush.bf16.msrb.mxu3 %v3224_v29  ;;  %v4180_v29 = vor.u32 %v4704_v15, %v4179_v13  ;;  %v3160_v34 = vor.u32 %v4446_v23, %v3157_v24  ;;  %v4526_v13 = vld [vmem:[#allocation5 + $0x3ac] sm:$0xf]  ;;  %v3477_v15 = vld [vmem:[#allocation5 + $0x3b8] sm:$0xf0] }
 0x107   :  { %2430 = vmatpush.bf16.msrb.mxu0 %v4100_v37  ;;  %v3141_v37 = vld [vmem:[#allocation5 + $0x118] sm:$0xf0]  ;;  %v2204_v39 = vpop.f32.mrf.mxu2  ;;  %v4590_v23 = vld [vmem:[#allocation5 + $0x5ac] sm:$0xf]  ;;  %v3480_v27 = vor.u32 %v4526_v13, %v3477_v15 }
 0x108   :  { %v3605_v17 = vld [vmem:[#allocation5 + $0x4b8] sm:$0xf0]  ;;  %v4478_v13 = vld [vmem:[#allocation5 + $0x22c] sm:$0xf] }
 0x109   :  { %2443 = vmatpush.bf16.msrb.mxu1 %v4228_v45  ;;  %2456 = vmatpush.bf16.msrb.mxu2 %v3080_v46  ;;  %v4502_v45 = vld [vmem:[#allocation5 + $0x2ec] sm:$0xf]  ;;  %v3381_v46 = vld [vmem:[#allocation5 + $0x2f8] sm:$0xf0]  ;;  %v3608_v28 = vor.u32 %v4558_v16, %v3605_v17 }
 0x10a   :  { %2469 = vmatpush.bf16.msrb.mxu3 %v3208_v50  ;;  %v2217_v48 = vpop.f32.mrf.mxu3  ;;  %v3509_v50 = vld [vmem:[#allocation5 + $0x3f8] sm:$0xf0]  ;;  %v4510_v15 = vld [vmem:[#allocation5 + $0x32c] sm:$0xf] }
 0x10b   :  { %2431 = vmatpush.bf16.msrb.mxu0 %v4084_v5  ;;  %v3765_v5 = vld [vmem:[#allocation5 + $0x5f8] sm:$0xf0]  ;;  %v3512_v59 = vor.u32 %v4534_v47, %v3509_v50  ;;  %v4518_v48 = vld [vmem:[#allocation5 + $0x36c] sm:$0xf] }
 0x10c   :  { %v3768_v63 = vor.u32 %v4598_v56, %v3765_v5  ;;  %v3733_v24 = vld [vmem:[#allocation5 + $0x5b8] sm:$0xf0]  ;;  %v421_v5 = vperm.slane %v5040_v40, 1 }
 0x10d   :  { %2444 = vmatpush.bf16.msrb.mxu1 %v4212_v57  ;;  %2457 = vmatpush.bf16.msrb.mxu2 %v3064_v58  ;;  %v3144_v57 = vor.u32 %v4442_v36, %v3141_v37  ;;  %v3384_v58 = vor.u32 %v4502_v45, %v3381_v46  ;;  %v3736_v32 = vor.u32 %v4590_v23, %v3733_v24  ;;  %v4586_v36 = vld [vmem:[#allocation5 + $0x58c] sm:$0xf]  ;;  %v3717_v37 = vld [vmem:[#allocation5 + $0x598] sm:$0xf0] }
 0x10e   :  { %2470 = vmatpush.bf16.msrb.mxu3 %v3192_v61  ;;  %v3365_v61 = vld [vmem:[#allocation5 + $0x2d8] sm:$0xf0]  ;;  %v4486_v46 = vld [vmem:[#allocation5 + $0x26c] sm:$0xf]  ;;  %v3720_v50 = vor.u32 %v4586_v36, %v3717_v37 }
 0x10f   :  { %2432 = vmatpush.bf16.msrb.mxu0 %v4068_v7  ;;  %v3749_v7 = vld [vmem:[#allocation5 + $0x5d8] sm:$0xf0]  ;;  %v3368_v8 = vor.u32 %v4498_v43, %v3365_v61  ;;  %v4514_v61 = vld [vmem:[#allocation5 + $0x34c] sm:$0xf] }
 0x110   :  { %v3317_v47 = vld [vmem:[#allocation5 + $0x278] sm:$0xf0]  ;;  %v4542_v24 = vld [vmem:[#allocation5 + $0x42c] sm:$0xf] }
 0x111   :  { %2445 = vmatpush.bf16.msrb.mxu1 %v4196_v9  ;;  %2458 = vmatpush.bf16.msrb.mxu2 %v3048_v10  ;;  %v3496_v9 = vor.u32 %v4530_v62, %v3493_v0  ;;  %v3624_v10 = vor.u32 %v4562_v2, %v3621_v3  ;;  %v3701_v56 = vld [vmem:[#allocation5 + $0x578] sm:$0xf0]  ;;  %v4546_v2 = vld [vmem:[#allocation5 + $0x44c] sm:$0xf] }
 0x112   :  { %2471 = vmatpush.bf16.msrb.mxu3 %v3176_v14  ;;  %v3752_v14 = vor.u32 %v4594_v6, %v3749_v7  ;;  %v3301_v43 = vld [vmem:[#allocation5 + $0x258] sm:$0xf0]  ;;  %v4578_v7 = vld [vmem:[#allocation5 + $0x54c] sm:$0xf] }
 0x113   :  { %2433 = vmatpush.bf16.msrb.mxu0 %v4052_v25  ;;  %v3352_v25 = vor.u32 %v4494_v11, %v3349_v12  ;;  %v3429_v0 = vld [vmem:[#allocation5 + $0x358] sm:$0xf0]  ;;  %v4538_v36 = vld [vmem:[#allocation5 + $0x40c] sm:$0xf] }
 0x114   :  { %v3557_v3 = vld [vmem:[#allocation5 + $0x458] sm:$0xf0]  ;;  %v3432_v11 = vor.u32 %v4514_v61, %v3429_v0  ;;  %v4626_v0 = vld [vmem:[#allocation5 + $0x6cc] sm:$0xf] }
 0x115   :  { %2446 = vmatpush.bf16.msrb.mxu1 %v4180_v29  ;;  %2459 = vmatpush.bf16.msrb.mxu2 %v3032_v30  ;;  %v4490_v29 = vld [vmem:[#allocation5 + $0x28c] sm:$0xf]  ;;  %v3333_v30 = vld [vmem:[#allocation5 + $0x298] sm:$0xf0]  ;;  %v3560_v12 = vor.u32 %v4546_v2, %v3557_v3 }
 0x116   :  { %2472 = vmatpush.bf16.msrb.mxu3 %v3160_v34  ;;  %v4554_v34 = vld [vmem:[#allocation5 + $0x48c] sm:$0xf]  ;;  %v3685_v40 = vld [vmem:[#allocation5 + $0x558] sm:$0xf0] }
 0x117   :  { %2434 = vmatpush.bf16.msrb.mxu0 %v4036_v49  ;;  %v5067_v39 = vpop.f32.mrf.mxu0  ;;  %v3592_v45 = vor.u32 %v4554_v34, %v3589_v35  ;;  %v3688_v17 = vor.u32 %v4578_v7, %v3685_v40  ;;  %v3413_v23 = vld [vmem:[#allocation5 + $0x338] sm:$0xf0]  ;;  %v4506_v34 = vld [vmem:[#allocation5 + $0x30c] sm:$0xf] }
 0x118   :  { %v3397_v35 = vld [vmem:[#allocation5 + $0x318] sm:$0xf0]  ;;  %v4658_v3 = vld [vmem:[#allocation5 + $0x7cc] sm:$0xf] }
 0x119   :  { %2447 = vmatpush.bf16.msrb.mxu1 %v4164_v54  ;;  %2460 = vmatpush.bf16.msrb.mxu2 %v3016_v55  ;;  %v5069_v49 = vpop.f32.mrf.mxu1  ;;  %v3573_v54 = vld [vmem:[#allocation5 + $0x478] sm:$0xf0]  ;;  %v4582_v55 = vld [vmem:[#allocation5 + $0x56c] sm:$0xf] }
 0x11a   :  { %2473 = vmatpush.bf16.msrb.mxu3 %v3144_v57  ;;  %2435 = vmatmul.bf16.vlgmr.msrb.gmra.mxu0 %v5024_v21  ;;  %v3320_v57 = vor.u32 %v4486_v46, %v3317_v47  ;;  %v3653_v46 = vld [vmem:[#allocation5 + $0x518] sm:$0xf0] }
 0x11b   :  { %2479 = vmatpush.bf16.msra.mxu0 %v3384_v58  ;;  %v3448_v58 = vor.u32 %v4518_v48, %v3445_v52  ;;  %v4630_v48 = vld [vmem:[#allocation5 + $0x6ec] sm:$0xf]  ;;  %v3877_v2 = vld [vmem:[#allocation5 + $0x6d8] sm:$0xf0] }
 0x11c   :  { %2448 = vmatmul.bf16.vlgmr.msrb.gmra.mxu1 %v5026_v26  ;;  %2461 = vmatmul.bf16.vlgmr.msrb.gmra.mxu2 %v5002_v19  ;;  %v3336_v19 = vor.u32 %v4490_v29, %v3333_v30  ;;  %v4474_v30 = vld [vmem:[#allocation5 + $0x20c] sm:$0xf]  ;;  %v4005_v40 = vld [vmem:[#allocation5 + $0x7d8] sm:$0xf0] }
 0x11d   :  { %2492 = vmatpush.bf16.msra.mxu1 %v3512_v59  ;;  %2505 = vmatpush.bf16.msra.mxu2 %v3640_v60  ;;  %v3576_v59 = vor.u32 %v4550_v53, %v3573_v54  ;;  %v4482_v60 = vld [vmem:[#allocation5 + $0x24c] sm:$0xf] }
 0x11e   :  { %2518 = vmatpush.bf16.msra.mxu3 %v3768_v63  ;;  %v3704_v63 = vor.u32 %v4582_v55, %v3701_v56  ;;  %v4662_v52 = vld [vmem:[#allocation5 + $0x7ec] sm:$0xf]  ;;  %v4149_v55 = vld [vmem:[#allocation5 + $0x8f8] sm:$0xf0] }
 0x11f   :  { %2480 = vmatpush.bf16.msra.mxu0 %v3368_v8  ;;  %2474 = vmatmul.bf16.vlgmr.msrb.gmra.mxu3 %v5006_v22  ;;  %v3464_v22 = vor.u32 %v4522_v31, %v3461_v33  ;;  %v5072_v62 = vpop.f32.mrf.mxu2  ;;  %v3304_v8 = vor.u32 %v4482_v60, %v3301_v43  ;;  %v3269_v31 = vld [vmem:[#allocation5 + $0x218] sm:$0xf0]  ;;  %v4694_v54 = vld [vmem:[#allocation5 + $0x8ec] sm:$0xf] }
 0x120   :  { %v3272_v53 = vor.u32 %v4474_v30, %v3269_v31 }
 0x121   :  { %2493 = vmatpush.bf16.msra.mxu1 %v3496_v9  ;;  %2506 = vmatpush.bf16.msra.mxu2 %v3624_v10  ;;  %v2230_v9 = vpop.f32.mrf.mxu0  ;;  %v2203_v10 = vadd.f32 %v5059_v1, %v421_v5  ;;  %v2243_v16 = vpop.f32.mrf.mxu1  ;;  %v3400_v5 = vor.u32 %v4506_v34, %v3397_v35  ;;  %v4682_v35 = vld [vmem:[#allocation5 + $0x88c] sm:$0xf] }
 0x122   :  { %2519 = vmatpush.bf16.msra.mxu3 %v3752_v14  ;;  %v5074_v6 = vpop.f32.mrf.mxu3  ;;  %v3285_v14 = vld [vmem:[#allocation5 + $0x238] sm:$0xf0] }
 0x123   :  { %2481 = vmatpush.bf16.msra.mxu0 %v3352_v25  ;;  %v3541_v25 = vld [vmem:[#allocation5 + $0x438] sm:$0xf0]  ;;  %v3288_v29 = vor.u32 %v4478_v13, %v3285_v14  ;;  %v2216_v1 = vadd.f32 %v5061_v4, %v2203_v10  ;;  %v4722_v10 = vld [vmem:[#allocation5 + $0x9cc] sm:$0xf]  ;;  %v4008_v13 = vor.u32 %v4658_v3, %v4005_v40 }
 0x124   :  { %v3544_v33 = vor.u32 %v4542_v24, %v3541_v25  ;;  %v4021_v4 = vld [vmem:[#allocation5 + $0x7f8] sm:$0xf0] }
 0x125   :  { %2494 = vmatpush.bf16.msra.mxu1 %v3480_v27  ;;  %2507 = vmatpush.bf16.msra.mxu2 %v3608_v28  ;;  %v4574_v27 = vld [vmem:[#allocation5 + $0x52c] sm:$0xf]  ;;  %v3669_v28 = vld [vmem:[#allocation5 + $0x538] sm:$0xf0]  ;;  %v2229_v56 = vadd.f32 %v5067_v39, %v2216_v1  ;;  %v4024_v61 = vor.u32 %v4662_v52, %v4021_v4 }
 0x126   :  { %2520 = vmatpush.bf16.msra.mxu3 %v3736_v32  ;;  %v3416_v32 = vor.u32 %v4510_v15, %v3413_v23  ;;  %v4133_v9 = vld [vmem:[#allocation5 + $0x8d8] sm:$0xf0]  ;;  %v4622_v15 = vld [vmem:[#allocation5 + $0x6ac] sm:$0xf] }
 0x127   :  { %2482 = vmatpush.bf16.msra.mxu0 %v3336_v19  ;;  %v2256_v37 = vpop.f32.mrf.mxu2  ;;  %v3672_v19 = vor.u32 %v4574_v27, %v3669_v28  ;;  %v2242_v39 = vadd.f32 %v5069_v49, %v2229_v56  ;;  %v3861_v16 = vld [vmem:[#allocation5 + $0x6b8] sm:$0xf0]  ;;  %v4686_v49 = vld [vmem:[#allocation5 + $0x8ac] sm:$0xf] }
 0x128   :  { %v3989_v24 = vld [vmem:[#allocation5 + $0x7b8] sm:$0xf0]  ;;  %v4718_v28 = vld [vmem:[#allocation5 + $0x9ac] sm:$0xf]  ;;  %v3864_v30 = vor.u32 %v4622_v15, %v3861_v16 }
 0x129   :  { %2495 = vmatpush.bf16.msra.mxu1 %v3464_v22  ;;  %2508 = vmatpush.bf16.msra.mxu2 %v3592_v45  ;;  %v3525_v22 = vld [vmem:[#allocation5 + $0x418] sm:$0xf0]  ;;  %v4570_v45 = vld [vmem:[#allocation5 + $0x50c] sm:$0xf]  ;;  %v2255_v27 = vadd.f32 %v5072_v62, %v2242_v39 }
 0x12a   :  { %2521 = vmatpush.bf16.msra.mxu3 %v3720_v50  ;;  %v2269_v47 = vpop.f32.mrf.mxu3  ;;  %v3893_v50 = vld [vmem:[#allocation5 + $0x6f8] sm:$0xf0]  ;;  %v3656_v60 = vor.u32 %v4570_v45, %v3653_v46  ;;  %v4646_v52 = vld [vmem:[#allocation5 + $0x76c] sm:$0xf] }
 0x12b   :  { %2483 = vmatpush.bf16.msra.mxu0 %v3320_v57  ;;  %v3528_v57 = vor.u32 %v4538_v36, %v3525_v22  ;;  %v3896_v43 = vor.u32 %v4630_v48, %v3893_v50  ;;  %v4117_v25 = vld [vmem:[#allocation5 + $0x8b8] sm:$0xf0]  ;;  %v4614_v48 = vld [vmem:[#allocation5 + $0x66c] sm:$0xf] }
 0x12c   :  { %v4120_v1 = vor.u32 %v4686_v49, %v4117_v25  ;;  %v3973_v62 = vld [vmem:[#allocation5 + $0x798] sm:$0xf0]  ;;  %v4706_v39 = vld [vmem:[#allocation5 + $0x94c] sm:$0xf] }
 0x12d   :  { %2496 = vmatpush.bf16.msra.mxu1 %v3448_v58  ;;  %2509 = vmatpush.bf16.msra.mxu2 %v3576_v59  ;;  %v4726_v58 = vld [vmem:[#allocation5 + $0x9ec] sm:$0xf]  ;;  %v4277_v59 = vld [vmem:[#allocation5 + $0x9f8] sm:$0xf0] }
 0x12e   :  { %2522 = vmatpush.bf16.msra.mxu3 %v3704_v63  ;;  %v4152_v63 = vor.u32 %v4694_v54, %v4149_v55  ;;  %v4280_v7 = vor.u32 %v4726_v58, %v4277_v59  ;;  %v4101_v36 = vld [vmem:[#allocation5 + $0x898] sm:$0xf0]  ;;  %v4678_v54 = vld [vmem:[#allocation5 + $0x86c] sm:$0xf] }
 0x12f   :  { %2484 = vmatpush.bf16.msra.mxu0 %v3304_v8  ;;  %v4690_v8 = vld [vmem:[#allocation5 + $0x8cc] sm:$0xf]  ;;  %v4104_v47 = vor.u32 %v4682_v35, %v4101_v36  ;;  %v3829_v50 = vld [vmem:[#allocation5 + $0x678] sm:$0xf0] }
 0x130   :  { %v4136_v14 = vor.u32 %v4690_v8, %v4133_v9  ;;  %v3957_v4 = vld [vmem:[#allocation5 + $0x778] sm:$0xf0]  ;;  %v4638_v49 = vld [vmem:[#allocation5 + $0x72c] sm:$0xf] }
 0x131   :  { %2497 = vmatpush.bf16.msra.mxu1 %v3432_v11  ;;  %2510 = vmatpush.bf16.msra.mxu2 %v3560_v12  ;;  %v4261_v11 = vld [vmem:[#allocation5 + $0x9d8] sm:$0xf0]  ;;  %v3880_v12 = vor.u32 %v4626_v0, %v3877_v2  ;;  %v3960_v59 = vor.u32 %v4646_v52, %v3957_v4 }
 0x132   :  { %2523 = vmatpush.bf16.msra.mxu3 %v3688_v17  ;;  %v4654_v17 = vld [vmem:[#allocation5 + $0x7ac] sm:$0xf]  ;;  %v4264_v23 = vor.u32 %v4722_v10, %v4261_v11  ;;  %v4085_v55 = vld [vmem:[#allocation5 + $0x878] sm:$0xf0] }
 0x133   :  { %2485 = vmatpush.bf16.msra.mxu0 %v3288_v29  ;;  %v4245_v29 = vld [vmem:[#allocation5 + $0x9b8] sm:$0xf0]  ;;  %v3992_v31 = vor.u32 %v4654_v17, %v3989_v24 }
 0x134   :  { %v4248_v34 = vor.u32 %v4718_v28, %v4245_v29  ;;  %v4213_v56 = vld [vmem:[#allocation5 + $0x978] sm:$0xf0]  ;;  %v4670_v28 = vld [vmem:[#allocation5 + $0x82c] sm:$0xf] }
 0x135   :  { %2498 = vmatpush.bf16.msra.mxu1 %v3416_v32  ;;  %2511 = vmatpush.bf16.msra.mxu2 %v3544_v33  ;;  %v3845_v32 = vld [vmem:[#allocation5 + $0x698] sm:$0xf0]  ;;  %v4650_v33 = vld [vmem:[#allocation5 + $0x78c] sm:$0xf] }
 0x136   :  { %2524 = vmatpush.bf16.msra.mxu3 %v3672_v19  ;;  %v4229_v19 = vld [vmem:[#allocation5 + $0x998] sm:$0xf0]  ;;  %v3976_v46 = vor.u32 %v4650_v33, %v3973_v62  ;;  %v4602_v33 = vld [vmem:[#allocation5 + $0x60c] sm:$0xf] }
 0x137   :  { %2486 = vmatpush.bf16.msra.mxu0 %v3272_v53  ;;  %v2280_v37 = vpop.f32.mrf.mxu0  ;;  %v3941_v3 = vld [vmem:[#allocation5 + $0x758] sm:$0xf0] }
 0x138   :  { %v4069_v40 = vld [vmem:[#allocation5 + $0x858] sm:$0xf0] }
 0x139   :  { %2499 = vmatpush.bf16.msra.mxu1 %v3400_v5  ;;  %2512 = vmatpush.bf16.msra.mxu2 %v3528_v57  ;;  %v2587_v5 = vand.u32 2147483647, %v5057_v51  ;;  %v3832_v57 = vor.u32 %v4614_v48, %v3829_v50  ;;  %v4197_v10 = vld [vmem:[#allocation5 + $0x958] sm:$0xf0] }
 0x13a   :  { %2525 = vmatpush.bf16.msra.mxu3 %v3656_v60  ;;  %2487 = vmatmul.bf16.vlgmr.msra.gmra.mxu0 %v5000_v18  ;;  %v2268_v18 = vadd.f32 %v5074_v6, %v2255_v27  ;;  %v4710_v6 = vld [vmem:[#allocation5 + $0x96c] sm:$0xf]  ;;  %v4088_v60 = vor.u32 %v4678_v54, %v4085_v55  ;;  %v3797_v24 = vld [vmem:[#allocation5 + $0x638] sm:$0xf0]  ;;  %v4200_v25 = vor.u32 %v4706_v39, %v4197_v10  ;;  %v4731_v39 = vld [vmem:[#allocation8 + $0x10] sm:$0xff] }
 0x13b   :  { %2531 = vmatpush.bf16.msrb.mxu0 %v3896_v43  ;;  %v4610_v43 = vld [vmem:[#allocation5 + $0x64c] sm:$0xf]  ;;  %v4216_v0 = vor.u32 %v4710_v6, %v4213_v56  ;;  %v3925_v27 = vld [vmem:[#allocation5 + $0x738] sm:$0xf0]  ;;  %v4735_v6 = vld [vmem:[#allocation8 + $0x30] sm:$0xff] }
 0x13c   :  { %2513 = vmatmul.bf16.vlgmr.msra.gmra.mxu2 %v5014_v41  ;;  %2500 = vmatmul.bf16.vlgmr.msra.gmra.mxu1 %v5004_v20  ;;  %v4618_v41 = vld [vmem:[#allocation5 + $0x68c] sm:$0xf]  ;;  %v2293_v20 = vpop.f32.mrf.mxu1  ;;  %v2281_v45 = vadd.f32 %v2280_v37, %v2268_v18  ;;  %v4053_v29 = vld [vmem:[#allocation5 + $0x838] sm:$0xf0]  ;;  %v3928_v62 = vor.u32 %v4638_v49, %v3925_v27  ;;  %v4743_v56 = vld [vmem:[#allocation8 + $0x70] sm:$0xff] }
 0x13d   :  { %2544 = vmatpush.bf16.msrb.mxu1 %v4024_v61  ;;  %2557 = vmatpush.bf16.msrb.mxu2 %v4152_v63  ;;  %v3848_v22 = vor.u32 %v4618_v41, %v3845_v32  ;;  %v3813_v61 = vld [vmem:[#allocation5 + $0x658] sm:$0xf0]  ;;  %v4642_v63 = vld [vmem:[#allocation5 + $0x74c] sm:$0xf]  ;;  %v4056_v35 = vor.u32 %v4670_v28, %v4053_v29 }
 0x13e   :  { %2570 = vmatpush.bf16.msrb.mxu3 %v4280_v7  ;;  %v2294_v58 = vadd.f32 %v2293_v20, %v2281_v45  ;;  %v4674_v7 = vld [vmem:[#allocation5 + $0x84c] sm:$0xf]  ;;  %v3944_v16 = vor.u32 %v4642_v63, %v3941_v3  ;;  %v3781_v36 = vld [vmem:[#allocation5 + $0x618] sm:$0xf0] }
 0x13f   :  { %2526 = vmatmul.bf16.vlgmr.msra.gmra.mxu3 %v5018_v44  ;;  %2532 = vmatpush.bf16.msrb.mxu0 %v3880_v12  ;;  %v4714_v44 = vld [vmem:[#allocation5 + $0x98c] sm:$0xf]  ;;  %v2306_v2 = vpop.f32.mrf.mxu2  ;;  %v2282_v11 = vpop.f32.mrf.mxu0  ;;  %v2591_v12 = vsub.f32 0.0, %v2587_v5  ;;  %v4072_v17 = vor.u32 %v4674_v7, %v4069_v40  ;;  %v3784_v50 = vor.u32 %v4602_v33, %v3781_v36  ;;  %v4736_v54 = vld [vmem:[#allocation8 + $0x38] sm:$0xff] }
 0x140   :  { %v4232_v53 = vor.u32 %v4714_v44, %v4229_v19  ;;  %v2307_v8 = vadd.f32 %v2306_v2, %v2294_v58  ;;  %v4634_v18 = vld [vmem:[#allocation5 + $0x70c] sm:$0xf]  ;;  %v3909_v44 = vld [vmem:[#allocation5 + $0x718] sm:$0xf0] }
 0x141   :  { %2545 = vmatpush.bf16.msrb.mxu1 %v4008_v13  ;;  %2558 = vmatpush.bf16.msrb.mxu2 %v4136_v14  ;;  %v3816_v13 = vor.u32 %v4610_v43, %v3813_v61  ;;  %v2595_v41 = vmul.f32 1.442695, %v2591_v12  ;;  %v4666_v19 = vld [vmem:[#allocation5 + $0x80c] sm:$0xf]  ;;  %v3912_v52 = vor.u32 %v4634_v18, %v3909_v44  ;;  %v4744_v55 = vld [vmem:[#allocation8 + $0x78] sm:$0xff]  ;;  %v4733_v61 = vld [vmem:[#allocation8 + $0x20] sm:$0xff] }
 0x142   :  { %2571 = vmatpush.bf16.msrb.mxu3 %v4264_v23  ;;  %v2319_v9 = vpop.f32.mrf.mxu3  ;;  %v4606_v23 = vld [vmem:[#allocation5 + $0x62c] sm:$0xf]  ;;  %v5096_v18 = vld [vmem:[#allocation7] sm:$0xf] }
 0x143   :  { %2533 = vmatpush.bf16.msrb.mxu0 %v3864_v30  ;;  %v5087_v15 = vadd.f32 %v2319_v9, %v2307_v8  ;;  %v3800_v32 = vor.u32 %v4606_v23, %v3797_v24  ;;  %4772 = vpow2.f32 %v2595_v41  ;;  %v4734_v58 = vld [vmem:[#allocation8 + $0x28] sm:$0xff] }
 0x144   :  { %v2295_v14 = vpop.f32.mrf.mxu1  ;;  %v4730_v49 = vld [vmem:[#allocation8 + $0x8] sm:$0xff] }
 0x145   :  { %2546 = vmatpush.bf16.msrb.mxu1 %v3992_v31  ;;  %2559 = vmatpush.bf16.msrb.mxu2 %v4120_v1  ;;  %v2588_v30 = vand.u32 2147483647, %v5087_v15  ;;  %v4702_v31 = vld [vmem:[#allocation5 + $0x92c] sm:$0xf]  ;;  %v4181_v1 = vld [vmem:[#allocation5 + $0x938] sm:$0xf0] }
 0x146   :  { %2572 = vmatpush.bf16.msrb.mxu3 %v4248_v34  ;;  %v4184_v37 = vor.u32 %v4702_v31, %v4181_v1  ;;  %v4738_v27 = vld [vmem:[#allocation8 + $0x48] sm:$0xff]  ;;  %v2583_v31 = vmax.f32 %v5057_v51, 0.0  ;;  %v2584_v41 = vmax.f32 %v5087_v15, 0.0  ;;  %v4752_v15 = vld [vmem:[#allocation8 + $0xb8] sm:$0xff] }
 0x147   :  { %2534 = vmatpush.bf16.msrb.mxu0 %v3848_v22  ;;  %v2592_v34 = vsub.f32 0.0, %v2588_v30  ;;  %v4037_v22 = vld [vmem:[#allocation5 + $0x818] sm:$0xf0]  ;;  %v2308_v20 = vpop.f32.mrf.mxu2 }
 0x149   :  { %2547 = vmatpush.bf16.msrb.mxu1 %v3976_v46  ;;  %2560 = vmatpush.bf16.msrb.mxu2 %v4104_v47  ;;  %v2597_v45 = vmul.f32 1.442695, %v2592_v34  ;;  %v4698_v46 = vld [vmem:[#allocation5 + $0x90c] sm:$0xf]  ;;  %v4165_v47 = vld [vmem:[#allocation5 + $0x918] sm:$0xf0]  ;;  %v4773_v5 = vpop.eup %4772 }
 0x14a   :  { %2573 = vmatpush.bf16.msrb.mxu3 %v4232_v53  ;;  %v2321_v48 = vpop.f32.mrf.mxu3  ;;  %v4040_v53 = vor.u32 %v4666_v19, %v4037_v22  ;;  %v4168_v4 = vor.u32 %v4698_v46, %v4165_v47  ;;  %v2609_v11 = vand.u32 2147483647, %v4773_v5  ;;  %v4737_v34 = vld [vmem:[#allocation8 + $0x40] sm:$0xff] }
 0x14b   :  { %2535 = vmatpush.bf16.msrb.mxu0 %v3832_v57  ;;  %4774 = vpow2.f32 %v2597_v45  ;;  %v4751_v45 = vld [vmem:[#allocation8 + $0xb0] sm:$0xff] }
 0x14c   :  { %vm2610_vm0 = vcmp.lt.f32.partialorder %v2609_v11, 0.0004427343 }
 0x14d   :  { %2548 = vmatpush.bf16.msrb.mxu1 %v3960_v59  ;;  %2561 = vmatpush.bf16.msrb.mxu2 %v4088_v60  ;;  %v2603_v59 = vadd.f32 1.0, %v4773_v5  ;;  %v4742_v60 = vld [vmem:[#allocation8 + $0x68] sm:$0xff] }
 0x14e   :  { %2574 = vmatpush.bf16.msrb.mxu3 %v4216_v0 }
 0x14f   :  { %2536 = vmatpush.bf16.msrb.mxu0 %v3816_v13  ;;  %4776 = vlog2.f32 %v2603_v59  ;;  %v4739_v13 = vld [vmem:[#allocation8 + $0x50] sm:$0xff]  ;;  %v4746_v59 = vld [vmem:[#allocation8 + $0x88] sm:$0xff] }
 0x151   :  { %2549 = vmatpush.bf16.msrb.mxu1 %v3944_v16  ;;  %2562 = vmatpush.bf16.msrb.mxu2 %v4072_v17  ;;  %v4775_v57 = vpop.eup %4774 }
 0x152   :  { %2575 = vmatpush.bf16.msrb.mxu3 %v4200_v25  ;;  %v2612_v43 = vadd.f32 1.0, %v4775_v57  ;;  %v2615_v2 = vmul.f32 -0.5, %v4775_v57  ;;  %v2618_v17 = vand.u32 2147483647, %v4775_v57 }
 0x153   :  { %2537 = vmatpush.bf16.msrb.mxu0 %v3800_v32  ;;  %v4729_v32 = vld [vmem:[#allocation8] sm:$0xff] }
 0x154   :  { %4778 = vlog2.f32 %v2612_v43  ;;  %v2616_v12 = vadd.f32 1.0, %v2615_v2  ;;  %vm2619_vm1 = vcmp.lt.f32.partialorder %v2618_v17, 0.0004427343 }
 0x155   :  { %2550 = vmatpush.bf16.msrb.mxu1 %v3928_v62  ;;  %2563 = vmatpush.bf16.msrb.mxu2 %v4056_v35  ;;  %v4777_v40 = vpop.eup %4776 }
 0x156   :  { %2576 = vmatpush.bf16.msrb.mxu3 %v4184_v37  ;;  %v2605_v16 = vmul.f32 0.6931472, %v4777_v40  ;;  %v2617_v25 = vmul.f32 %v4775_v57, %v2616_v12  ;;  %v422_v37 = vperm.slane %v5096_v18, 2  ;;  %v4747_v57 = vld [vmem:[#allocation8 + $0x90] sm:$0xff] }
 0x157   :  { %2538 = vmatpush.bf16.msrb.mxu0 %v3784_v50  ;;  %v2332_v63 = vpop.f32.mrf.mxu0 }
 0x158   :  { %v2333_v51 = vadd.f32 %v2332_v63, %v422_v37 }
 0x159   :  { %2551 = vmatpush.bf16.msrb.mxu1 %v3912_v52  ;;  %2564 = vmatpush.bf16.msrb.mxu2 %v4040_v53  ;;  %v2345_v0 = vpop.f32.mrf.mxu1  ;;  %v4750_v52 = vld [vmem:[#allocation8 + $0xa8] sm:$0xff] }
 0x15a   :  { %2577 = vmatpush.bf16.msrb.mxu3 %v4168_v4  ;;  %2539 = vmatmul.bf16.vlgmr.msrb.gmra.mxu0 %v5012_v38  ;;  %v4741_v38 = vld [vmem:[#allocation8 + $0x60] sm:$0xff]  ;;  %v4779_v8 = vpop.eup %4778  ;;  %v2346_v22 = vadd.f32 %v2345_v0, %v2333_v51 }
 0x15b   :  { %2907 = vmatpush.bf16.msra.mxu0 %v4736_v54  ;;  %v2614_v23 = vmul.f32 0.6931472, %v4779_v8  ;;  %v4749_v54 = vld [vmem:[#allocation8 + $0xa0] sm:$0xff] }
 0x15c   :  { %2552 = vmatmul.bf16.vlgmr.msrb.gmra.mxu1 %v5016_v42  ;;  %2565 = vmatmul.bf16.vlgmr.msrb.gmra.mxu2 %v5024_v21  ;;  %v2606_v42 = vmul.f32 -0.5, %v4773_v5  ;;  %v4732_v21 = vld [vmem:[#allocation8 + $0x18] sm:$0xff] }
 0x15d   :  { %2920 = vmatpush.bf16.msra.mxu1 %v4744_v55  ;;  %2578 = vmatmul.bf16.vlgmr.msrb.gmra.mxu3 %v5026_v26  ;;  %v4740_v26 = vld [vmem:[#allocation8 + $0x58] sm:$0xff]  ;;  %v2620_v1 = vsel %vm2619_vm1, %v2617_v25, %v2614_v23 }
 0x15e   :  { %v2607_v9 = vadd.f32 1.0, %v2606_v42  ;;  %v2640_v62 = vadd.f32 %v2620_v1, %v2584_v41  ;;  %2933 = vmatpush.bf16.msra.mxu2 %v4752_v15  ;;  %v4756_v15 = vld [vmem:[#allocation8 + $0xd8] sm:$0xff] }
 0x15f   :  { %2908 = vmatpush.bf16.msra.mxu0 %v4735_v6  ;;  %v2358_v3 = vpop.f32.mrf.mxu2  ;;  %v2334_v10 = vpop.f32.mrf.mxu0 }
 0x160   :  { %v2608_v24 = vmul.f32 %v4773_v5, %v2607_v9  ;;  %v2644_v36 = vpack.c.bf16 %v2640_v62, %v2640_v62  ;;  %v2359_v47 = vadd.f32 %v2358_v3, %v2346_v22  ;;  %v4755_v22 = vld [vmem:[#allocation8 + $0xd0] sm:$0xff] }
 0x161   :  { %2921 = vmatpush.bf16.msra.mxu1 %v4743_v56  ;;  %v2347_v14 = vpop.f32.mrf.mxu1  ;;  %v4748_v56 = vld [vmem:[#allocation8 + $0x98] sm:$0xff] }
 0x162   :  { %v2371_v7 = vpop.f32.mrf.mxu3  ;;  %v2611_v29 = vsel %vm2610_vm0, %v2608_v24, %v2605_v16  ;;  %2934 = vmatpush.bf16.msra.mxu2 %v4751_v45 }
 0x163   :  { %2909 = vmatpush.bf16.msra.mxu0 %v4734_v58  ;;  %v2639_v33 = vadd.f32 %v2611_v29, %v2583_v31  ;;  %v2372_v53 = vadd.f32 %v2371_v7, %v2359_v47  ;;  %v423_v29 = vperm.slane %v5096_v18, 3  ;;  %v4760_v31 = vld [vmem:[#allocation8 + $0xf8] sm:$0xff]  ;;  %v4754_v47 = vld [vmem:[#allocation8 + $0xc8] sm:$0xff] }
 0x164   :  { %2946 = vmatpush.bf16.msra.mxu3 %v4760_v31 }
 0x165   :  { %2922 = vmatpush.bf16.msra.mxu1 %v4742_v60  ;;  %v2643_v35 = vpack.c.bf16 %v2639_v33, %v2639_v33 }
 0x166   :  { %2935 = vmatpush.bf16.msra.mxu2 %v4750_v52 }
 0x167   :  { %2910 = vmatpush.bf16.msra.mxu0 %v4733_v61  ;;  %v2360_v28 = vpop.f32.mrf.mxu2  ;;  %v4745_v61 = vld [vmem:[#allocation8 + $0x80] sm:$0xff] }
 0x169   :  { %2923 = vmatpush.bf16.msra.mxu1 %v4741_v38 }
 0x16a   :  { %v2373_v30 = vpop.f32.mrf.mxu3  ;;  %2936 = vmatpush.bf16.msra.mxu2 %v4749_v54 }
 0x16b   :  { %2911 = vmatpush.bf16.msra.mxu0 %v4732_v21 }
 0x16d   :  { %2924 = vmatpush.bf16.msra.mxu1 %v4740_v26 }
 0x16e   :  { %2937 = vmatpush.bf16.msra.mxu2 %v4748_v56 }
 0x16f   :  { %2912 = vmatpush.bf16.msra.mxu0 %v4731_v39 }
 0x171   :  { %2925 = vmatpush.bf16.msra.mxu1 %v4739_v13 }
 0x172   :  { %2938 = vmatpush.bf16.msra.mxu2 %v4747_v57 }
 0x173   :  { %2913 = vmatpush.bf16.msra.mxu0 %v4730_v49 }
 0x175   :  { %2926 = vmatpush.bf16.msra.mxu1 %v4738_v27 }
 0x176   :  { %2939 = vmatpush.bf16.msra.mxu2 %v4746_v59 }
 0x177   :  { %2914 = vmatpush.bf16.msra.mxu0 %v4729_v32  ;;  %v2384_v44 = vpop.f32.mrf.mxu0 }
 0x178   :  { %v2385_v6 = vadd.f32 %v2384_v44, %v2372_v53  ;;  %v4757_v44 = vld [vmem:[#allocation8 + $0xe0] sm:$0xff] }
 0x179   :  { %2927 = vmatpush.bf16.msra.mxu1 %v4737_v34  ;;  %v2397_v19 = vpop.f32.mrf.mxu1  ;;  %v4759_v34 = vld [vmem:[#allocation8 + $0xf0] sm:$0xff] }
 0x17a   :  { %2915 = vmatmul.bf16.vlgmr.msra.gmra.mxu0 %v2643_v35  ;;  %v2398_v5 = vadd.f32 %v2397_v19, %v2385_v6  ;;  %2940 = vmatpush.bf16.msra.mxu2 %v4745_v61 }
 0x17b   :  { %2947 = vmatpush.bf16.msra.mxu3 %v4759_v34 }
 0x17c   :  { %2928 = vmatmul.bf16.vlgmr.msra.gmra.mxu1 %v2644_v36  ;;  %v4758_v36 = vld [vmem:[#allocation8 + $0xe8] sm:$0xff] }
 0x17f   :  { %v2410_v20 = vpop.f32.mrf.mxu2  ;;  %v2386_v48 = vpop.f32.mrf.mxu0  ;;  %2948 = vmatpush.bf16.msra.mxu3 %v4758_v36 }
 0x180   :  { %v2411_v58 = vadd.f32 %v2410_v20, %v2398_v5 }
 0x181   :  { %v2399_v50 = vpop.f32.mrf.mxu1 }
 0x182   :  { %v2423_v46 = vpop.f32.mrf.mxu3  ;;  %v4753_v50 = vld [vmem:[#allocation8 + $0xc0] sm:$0xff] }
 0x183   :  { %v2424_v60 = vadd.f32 %v2423_v46, %v2411_v58  ;;  %2949 = vmatpush.bf16.msra.mxu3 %v4757_v44 }
 0x187   :  { %v2412_v4 = vpop.f32.mrf.mxu2  ;;  %2950 = vmatpush.bf16.msra.mxu3 %v4756_v15 }
 0x18a   :  { %v2425_v55 = vpop.f32.mrf.mxu3 }
 0x18b   :  { %2951 = vmatpush.bf16.msra.mxu3 %v4755_v22 }
 0x18f   :  { %2952 = vmatpush.bf16.msra.mxu3 %v4754_v47 }
 0x193   :  { %2953 = vmatpush.bf16.msra.mxu3 %v4753_v50 }
 0x197   :  { %v2436_v43 = vpop.f32.mrf.mxu0 }
 0x198   :  { %v2437_v63 = vadd.f32 %v2436_v43, %v2424_v60 }
 0x199   :  { %v2449_v38 = vpop.f32.mrf.mxu1 }
 0x19a   :  { %v2450_v0 = vadd.f32 %v2449_v38, %v2437_v63  ;;  %v4771_v38 = vld [vmem:[#allocation10] ss:$0 sm:$0xff] }
 0x19c   :  { %v2589_v42 = vand.u32 2147483647, %v2450_v0  ;;  %v2585_v23 = vmax.f32 %v2450_v0, 0.0 }
 0x19e   :  { %v2593_v21 = vsub.f32 0.0, %v2589_v42 }
 0x19f   :  { %v2462_v2 = vpop.f32.mrf.mxu2  ;;  %v2438_v3 = vpop.f32.mrf.mxu0 }
 0x1a0   :  { %v2599_v7 = vmul.f32 1.442695, %v2593_v21  ;;  %v2463_v41 = vadd.f32 %v2462_v2, %v423_v29 }
 0x1a1   :  { %v2451_v40 = vpop.f32.mrf.mxu1 }
 0x1a2   :  { %v2475_v26 = vpop.f32.mrf.mxu3  ;;  %4780 = vpow2.f32 %v2599_v7 }
 0x1a3   :  { %v2476_v62 = vadd.f32 %v2475_v26, %v2463_v41 }
 0x1a7   :  { %v2464_v8 = vpop.f32.mrf.mxu2 }
 0x1a8   :  { %v4781_v39 = vpop.eup %4780 }
 0x1a9   :  { %v2621_v10 = vadd.f32 1.0, %v4781_v39  ;;  %v2624_v11 = vmul.f32 -0.5, %v4781_v39  ;;  %v2627_v13 = vand.u32 2147483647, %v4781_v39 }
 0x1aa   :  { %v2477_v9 = vpop.f32.mrf.mxu3 }
 0x1ab   :  { %4782 = vlog2.f32 %v2621_v10  ;;  %v2625_v12 = vadd.f32 1.0, %v2624_v11  ;;  %vm2628_vm2 = vcmp.lt.f32.partialorder %v2627_v13, 0.0004427343 }
 0x1ad   :  { %v2626_v17 = vmul.f32 %v4781_v39, %v2625_v12 }
 0x1b1   :  { %v4783_v14 = vpop.eup %4782 }
 0x1b2   :  { %v2623_v16 = vmul.f32 0.6931472, %v4783_v14 }
 0x1b4   :  { %v2629_v24 = vsel %vm2628_vm2, %v2626_v17, %v2623_v16 }
 0x1b5   :  { %v2641_v49 = vadd.f32 %v2629_v24, %v2585_v23 }
 0x1b7   :  { %v2488_v25 = vpop.f32.mrf.mxu0  ;;  %v2645_v27 = vpack.c.bf16 %v2641_v49, %v2641_v49 }
 0x1b8   :  { %v2489_v51 = vadd.f32 %v2488_v25, %v2476_v62 }
 0x1b9   :  { %v2501_v28 = vpop.f32.mrf.mxu1  ;;  %2941 = vmatmul.bf16.vlgmr.msra.gmra.mxu2 %v2645_v27 }
 0x1ba   :  { %v2502_v19 = vadd.f32 %v2501_v28, %v2489_v51 }
 0x1bf   :  { %v2514_v30 = vpop.f32.mrf.mxu2  ;;  %v2490_v32 = vpop.f32.mrf.mxu0 }
 0x1c0   :  { %v2515_v18 = vadd.f32 %v2514_v30, %v2502_v19 }
 0x1c1   :  { %v2503_v33 = vpop.f32.mrf.mxu1 }
 0x1c2   :  { %v2527_v1 = vpop.f32.mrf.mxu3 }
 0x1c3   :  { %v2528_v20 = vadd.f32 %v2527_v1, %v2515_v18 }
 0x1c7   :  { %v2516_v35 = vpop.f32.mrf.mxu2 }
 0x1ca   :  { %v2529_v37 = vpop.f32.mrf.mxu3 }
 0x1d7   :  { %v2540_v45 = vpop.f32.mrf.mxu0 }
 0x1d8   :  { %v2541_v48 = vadd.f32 %v2540_v45, %v2528_v20 }
 0x1d9   :  { %v2553_v46 = vpop.f32.mrf.mxu1 }
 0x1da   :  { %v2554_v52 = vadd.f32 %v2553_v46, %v2541_v48 }
 0x1df   :  { %v2566_v53 = vpop.f32.mrf.mxu2  ;;  %v2542_v55 = vpop.f32.mrf.mxu0 }
 0x1e0   :  { %v2567_v4 = vadd.f32 %v2566_v53, %v2554_v52  ;;  %v2579_v54 = vpop.f32.mrf.mxu3 }
 0x1e1   :  { %v2555_v6 = vpop.f32.mrf.mxu1 }
 0x1e2   :  { %v2580_v56 = vadd.f32 %v2579_v54, %v2567_v4 }
 0x1e4   :  { %v2590_v5 = vand.u32 2147483647, %v2580_v56  ;;  %v2586_v9 = vmax.f32 %v2580_v56, 0.0 }
 0x1e6   :  { %v2594_v57 = vsub.f32 0.0, %v2590_v5 }
 0x1e7   :  { %v2568_v58 = vpop.f32.mrf.mxu2 }
 0x1e8   :  { %v2601_v59 = vmul.f32 1.442695, %v2594_v57  ;;  %v2581_v60 = vpop.f32.mrf.mxu3 }
 0x1ea   :  { %4784 = vpow2.f32 %v2601_v59 }
 0x1f0   :  { %v4785_v43 = vpop.eup %4784 }
 0x1f1   :  { %v2630_v61 = vadd.f32 1.0, %v4785_v43  ;;  %v2633_v63 = vmul.f32 -0.5, %v4785_v43  ;;  %v2636_v21 = vand.u32 2147483647, %v4785_v43 }
 0x1f3   :  { %4786 = vlog2.f32 %v2630_v61  ;;  %v2634_v0 = vadd.f32 1.0, %v2633_v63  ;;  %vm2637_vm3 = vcmp.lt.f32.partialorder %v2636_v21, 0.0004427343 }
 0x1f5   :  { %v2635_v8 = vmul.f32 %v4785_v43, %v2634_v0 }
 0x1f7   :  { %v2916_v42 = vpop.f32.mrf.mxu0 }
 0x1f8   :  { %v2917_v2 = vadd.f32 %v4771_v38, %v2916_v42 }
 0x1f9   :  { %v2929_v26 = vpop.f32.mrf.mxu1  ;;  %v4787_v3 = vpop.eup %4786 }
 0x1fa   :  { %v2930_v7 = vadd.f32 %v2929_v26, %v2917_v2  ;;  %v2632_v40 = vmul.f32 0.6931472, %v4787_v3 }
 0x1fc   :  { %v2638_v39 = vsel %vm2637_vm3, %v2635_v8, %v2632_v40 }
 0x1fd   :  { %v2642_v10 = vadd.f32 %v2638_v39, %v2586_v9 }
 0x1ff   :  { %v2918_v11 = vpop.f32.mrf.mxu0  ;;  %v2646_v12 = vpack.c.bf16 %v2642_v10, %v2642_v10 }
 0x201   :  { %v2931_v13 = vpop.f32.mrf.mxu1  ;;  %2954 = vmatmul.bf16.vlgmr.msra.gmra.mxu3 %v2646_v12 }
 0x23c   :  { %v2942_v14 = vpop.f32.mrf.mxu2 }
 0x23d   :  { %v2943_v16 = vadd.f32 %v2942_v14, %v2930_v7 }
 0x244   :  { %v2944_v17 = vpop.f32.mrf.mxu2 }
 0x284   :  { %v2955_v23 = vpop.f32.mrf.mxu3 }
 0x285   :  { %v2956_v24 = vadd.f32 %v2955_v23, %v2943_v16 }
 0x287   :  { %2959 = vmax.xlane.f32.xlu0 %v2956_v24 }
 0x28c   :  { %v2957_v49 = vpop.f32.mrf.mxu3 }
 0x2fa   :  { %v2960_v25 = vpop.xlane.xlu0 %2959 }
 0x2fb   :  { %v2961_v27 = vsub.f32 %v2956_v24, %v2960_v25 }
 0x2fd   :  { %v2962_v28 = vmul.f32 1.442695, %v2961_v27 }
 0x2ff   :  { %4788 = vpow2.f32 %v2962_v28 }
 0x305   :  { %v4789_v29 = vpop.eup %4788 }
 0x306   :  { %2964 = vadd.xlane.f32.xlu0 %v4789_v29 }
 0x379   :  { %v2965_v30 = vpop.xlane.xlu0 %2964 }
 0x37a   :  { %4790 = vrcp.f32 %v2965_v30  ;;  %v2977_v32 = vand.u32 2147483648, %v2965_v30  ;;  %v2975_v34 = vand.u32 2147483647, %v2965_v30  ;;  %vm2971_vm5 = vweird.f32 %v2965_v30 }
 0x37c   :  { %v2978_v35 = vor.u32 1.1754944e-38, %v2977_v32  ;;  %vm2976_vm7 = vcmp.eq.f32.partialorder %v2975_v34, 8.507059e+37 }
 0x380   :  { %v4791_v31 = vpop.eup %4790 }
 0x381   :  { %v2967_v1 = vmul.f32 %v4791_v31, %v2965_v30  ;;  %vm2972_vm4 = vweird.f32 %v4791_v31 }
 0x382   :  { %vm2973_vm6 = vmor %vm2971_vm5, %vm2972_vm4 }
 0x383   :  { %v2968_v41 = vsub.f32 1.0, %v2967_v1 }
 0x385   :  { %v2969_v33 = vmul.f32 %v4791_v31, %v2968_v41 }
 0x387   :  { %v2970_v62 = vadd.f32 %v4791_v31, %v2969_v33 }
 0x389   :  { %v2974_v36 = vsel %vm2973_vm6, %v4791_v31, %v2970_v62 }
 0x38a   :  { %v2979_v37 = vsel %vm2976_vm7, %v2978_v35, %v2974_v36 }
 0x38b   :  { %v2980_v51 = vmul.f32 %v4789_v29, %v2979_v37 }
 0x38d   :  { %2981 = vst [vmem:[#allocation11] sm:$0xff] %v2980_v51 }
 0x38e   :  { %2992 = dma.vmem_to_hbm [thread:$0]  %s2988_s4, 128, %s2990_s21, [#allocation4]  }
 0x38f   :  { %4943 = dma.done.wait [#allocation4], 128  }
 0x390   :  { %4944 = vsyncadd [#allocation4], 4294967168 }
 0x391   :  { %2997 = vsyncpa [#allocation3], 1 }
 0x392   :  { %2998 = vsyncpa [#allocation6], 1 }
 0x393   :  { %2999 = vsyncpa [#allocation9], 1 }
 0x394   :  { %3000 = vsyncpa [#allocation4], 1 }

</bundles_post_ra>
